<compile_context>
chip_gen: v7x
topology: tpu7x:2x2x1
jax: 0.10.0
libtpu: 0.0.40
codegen_flags: <defaults>
</compile_context>

<pallas_src>
import functools

import jax
import jax.numpy as jnp
from jax import lax
from jax.experimental import pallas as pl
from jax.experimental.pallas import tpu as pltpu

EPS = 1e-5


def _round_up(x, m):
    return -(-x // m) * m


# -----------------------------------------------------------------------------
# Fused InvertedResidual kernel (one grid step = one image x one output-row tile)
# -----------------------------------------------------------------------------
def _fused_ir_kernel(*refs, stride, expand, shortcut, th_out, w_out,
                     h_in, w_in, chid, cout):
    s = stride
    nplanes = s * s
    i = 0
    plane_refs = refs[i:i + nplanes]
    i += nplanes
    if expand:
        we_ref, s1_ref, b1_ref = refs[i], refs[i + 1], refs[i + 2]
        i += 3
    wdw_ref, s2_ref, b2_ref = refs[i], refs[i + 1], refs[i + 2]
    i += 3
    wp_ref, s3_ref, b3_ref = refs[i], refs[i + 1], refs[i + 2]
    i += 3
    res_ref = refs[i] if shortcut else None
    o_ref = refs[-1]

    t = pl.program_id(1)
    oh0 = t * th_out                       # first output row of this tile
    if th_out % 8 == 0:
        oh0 = pl.multiple_of(oh0, 8)

    # ---- stage 1: 1x1 expansion + BN + ReLU6, one parity plane at a time ----
    # The expanded ("hidden") activation stays in VMEM as values; it is never
    # written back to HBM (this was the dominant HBM cost before fusion).
    hid = {}
    for pr in range(s):
        for pc in range(s):
            xr = plane_refs[pr * s + pc]
            rows = th_out + (2 - pr) // s          # output rows + depthwise halo
            wp = xr.shape[2]                       # alignment-padded plane width
            cin = xr.shape[3]
            xwin = xr[0, pl.ds(oh0, rows), :, :]   # (rows, wp, cin)
            if expand:
                x2d = xwin.reshape(rows * wp, cin)   # layout-trivial: wp % 16 == 0
                hc = jnp.dot(x2d, we_ref[...],       # bf16 x bf16 -> f32 on MXU
                             preferred_element_type=jnp.float32)
                hc = jnp.clip(hc * s1_ref[0] + b1_ref[0], 0.0, 6.0)
                h3 = hc.reshape(rows, wp, chid)
            else:
                h3 = xwin.astype(jnp.float32)
            # Zero hidden values at the 3x3 conv's zero-padding positions (and
            # at the width-alignment padding) -- replaces the jnp.pad of the
            # big expanded activation that the unfused version needed.
            prow = (oh0 + lax.broadcasted_iota(jnp.int32, h3.shape, 0)) * s + pr
            pcol = lax.broadcasted_iota(jnp.int32, h3.shape, 1) * s + pc
            keep = (prow >= 1) & (prow <= h_in) & (pcol >= 1) & (pcol <= w_in)
            hid[(pr, pc)] = jnp.where(keep, h3, 0.0)

    # ---- stage 2: depthwise 3x3 + BN + ReLU6 (stride folded into planes) ----
    acc = jnp.zeros((th_out, w_out, chid), jnp.float32)
    for kh in range(3):
        for kw in range(3):
            pln = hid[(kh % s, kw % s)]
            tap = pln[kh // s:kh // s + th_out, kw // s:kw // s + w_out, :]
            acc = acc + tap * wdw_ref[kh * 3 + kw, :]
    acc = jnp.clip(acc * s2_ref[0] + b2_ref[0], 0.0, 6.0)

    # ---- stage 3: 1x1 projection + BN (+ residual) ---------------------------
    if w_out % 8 == 0:
        a2d = acc.reshape(th_out * w_out, chid)    # layout-trivial: w_out % 8 == 0
        y = jnp.dot(a2d.astype(jnp.bfloat16), wp_ref[...],
                    preferred_element_type=jnp.float32)
        y3 = (y * s3_ref[0] + b3_ref[0]).reshape(th_out, w_out, cout)
    else:
        # Non-8-aligned output width: one small matmul per output row
        # (avoids a relayout-heavy reshape).
        out_rows = []
        for r in range(th_out):
            yr = jnp.dot(acc[r].astype(jnp.bfloat16), wp_ref[...],
                         preferred_element_type=jnp.float32)
            out_rows.append(yr * s3_ref[0] + b3_ref[0])
        y3 = jnp.stack(out_rows, axis=0)

    if shortcut:
        y3 = y3 + res_ref[0]
    o_ref[0] = y3.astype(o_ref.dtype)


# -----------------------------------------------------------------------------
# Wrapper: NCHW in / NCHW out, builds parity planes, grid, BlockSpecs
# -----------------------------------------------------------------------------
def inverted_residual_forward(x_nchw, params, *, stride, expand_ratio):
    N, Cin, H, W = x_nchw.shape
    Cout = params["w_proj"].shape[1]
    Chid = params["w_dw"].shape[-1]
    expand = expand_ratio != 1
    use_shortcut = (stride == 1) and (Cin == Cout)
    s = stride
    H_out = (H - 1) // s + 1
    W_out = (W - 1) // s + 1

    # Output-row tile: largest divisor of H_out that is <= 8.  Per-tile VMEM
    # footprint (hidden window + in/out tiles, double-buffered) stays far under
    # the 32 MiB scoped budget even at the largest MobileNetV2 feature maps,
    # so the same tile size is safe on v7x's 64 MiB VMEM.
    th_out = max(d for d in range(1, min(H_out, 8) + 1) if H_out % d == 0)
    n_t = H_out // th_out

    x_nhwc = jnp.transpose(x_nchw, (0, 2, 3, 1)).astype(jnp.float32)
    # zero-pad the *small, pre-expansion* input for the 3x3 conv (pad=1)
    x_pad = jnp.pad(x_nhwc, ((0, 0), (1, 1), (1, 1), (0, 0)))

    plane_dtype = jnp.bfloat16 if expand else jnp.float32
    w_align = 16 if expand else 8          # bf16 sublane packing needs 16

    inputs, in_specs = [], []

    # stride x stride parity planes of the padded input (plain XLA slicing).
    for pr in range(s):
        for pc in range(s):
            p = x_pad[:, pr::s, pc::s, :]
            wp8 = _round_up(p.shape[2], w_align)
            if wp8 != p.shape[2]:
                p = jnp.pad(p, ((0, 0), (0, 0), (0, wp8 - p.shape[2]), (0, 0)))
            p = p.astype(plane_dtype)
            inputs.append(p)
            in_specs.append(pl.BlockSpec((1,) + p.shape[1:],
                                         lambda n, t: (n, 0, 0, 0)))

    def add_whole(arr):
        inputs.append(arr)
        in_specs.append(pl.BlockSpec(arr.shape,
                                     lambda n, t, nd=arr.ndim: (0,) * nd))

    if expand:
        add_whole(params["w_expand"].astype(jnp.bfloat16))
        add_whole(params["s1"].reshape(1, Chid).astype(jnp.float32))
        add_whole(params["b1"].reshape(1, Chid).astype(jnp.float32))
    add_whole(params["w_dw"].reshape(9, Chid).astype(jnp.float32))
    add_whole(params["s2"].reshape(1, Chid).astype(jnp.float32))
    add_whole(params["b2"].reshape(1, Chid).astype(jnp.float32))
    add_whole(params["w_proj"].astype(jnp.bfloat16))
    add_whole(params["s3"].reshape(1, Cout).astype(jnp.float32))
    add_whole(params["b3"].reshape(1, Cout).astype(jnp.float32))
    if use_shortcut:
        inputs.append(x_nhwc)
        in_specs.append(pl.BlockSpec((1, th_out, W_out, Cout),
                                     lambda n, t: (n, t, 0, 0)))

    out_spec = pl.BlockSpec((1, th_out, W_out, Cout), lambda n, t: (n, t, 0, 0))
    out_shape = jax.ShapeDtypeStruct((N, H_out, W_out, Cout), jnp.float32)

    kernel = functools.partial(
        _fused_ir_kernel, stride=s, expand=expand, shortcut=use_shortcut,
        th_out=th_out, w_out=W_out, h_in=H, w_in=W, chid=Chid, cout=Cout)

    flops = 2 * N * H_out * W_out * Chid * (9 + Cout)
    if expand:
        flops += 2 * N * (H + 2) * (W + 2) * Cin * Chid
    bytes_accessed = sum(int(a.size) * a.dtype.itemsize for a in inputs)
    bytes_accessed += N * H_out * W_out * Cout * 4

    out = pl.pallas_call(
        kernel,
        out_shape=out_shape,
        grid=(N, n_t),
        in_specs=in_specs,
        out_specs=out_spec,
        compiler_params=pltpu.CompilerParams(
            dimension_semantics=("parallel", "parallel"),
            vmem_limit_bytes=32 * 1024 * 1024),
        cost_estimate=pl.CostEstimate(flops=int(flops), transcendentals=0,
                                      bytes_accessed=int(bytes_accessed)),
    )(*inputs)
    return jnp.transpose(out, (0, 3, 1, 2))  # NHWC -> NCHW


# -----------------------------------------------------------------------------
# Pure-JAX f32 reference (for the correctness self-check)
# -----------------------------------------------------------------------------
def reference_forward(x_nchw, params, *, stride, expand_ratio):
    in_c = x_nchw.shape[1]
    out_c = params["w_proj"].shape[1]
    use_shortcut = (stride == 1) and (in_c == out_c)
    x = jnp.transpose(x_nchw, (0, 2, 3, 1))

    h = x
    if expand_ratio != 1:
        h = jnp.einsum("nhwc,cd->nhwd", h, params["w_expand"])
        h = jnp.clip(h * params["s1"] + params["b1"], 0.0, 6.0)

    N, H, W, C = h.shape
    hp = jnp.pad(h, ((0, 0), (1, 1), (1, 1), (0, 0)))
    w_dw = params["w_dw"].reshape(9, C)
    acc = jnp.zeros((N, H, W, C), jnp.float32)
    for kh in range(3):
        for kw in range(3):
            acc = acc + hp[:, kh:kh + H, kw:kw + W, :] * w_dw[kh * 3 + kw]
    acc = jnp.clip(acc * params["s2"] + params["b2"], 0.0, 6.0)
    acc = acc[:, ::stride, ::stride, :]

    y = jnp.einsum("nhwc,cd->nhwd", acc, params["w_proj"])
    y = y * params["s3"] + params["b3"]
    if use_shortcut:
        y = y + x
    return jnp.transpose(y, (0, 3, 1, 2))


def make_params(key, in_c, out_c, expand_ratio):
    hidden = int(in_c * expand_ratio)
    ks = jax.random.split(key, 9)

    def bn_fold(gamma, beta):
        # inference mode: running_mean=0, running_var=1 at init
        return gamma / jnp.sqrt(1.0 + EPS), beta

    w_expand = jax.random.normal(ks[0], (in_c, hidden), jnp.float32) * 0.1
    g1 = 1.0 + 0.1 * jax.random.normal(ks[1], (hidden,), jnp.float32)
    bt1 = 0.1 * jax.random.normal(ks[2], (hidden,), jnp.float32)
    s1, b1 = bn_fold(g1, bt1)

    w_dw = jax.random.normal(ks[3], (3, 3, hidden), jnp.float32) * 0.1
    g2 = 1.0 + 0.1 * jax.random.normal(ks[4], (hidden,), jnp.float32)
    bt2 = 0.1 * jax.random.normal(ks[5], (hidden,), jnp.float32)
    s2, b2 = bn_fold(g2, bt2)

    w_proj = jax.random.normal(ks[6], (hidden, out_c), jnp.float32) * 0.1
    g3 = 1.0 + 0.1 * jax.random.normal(ks[7], (out_c,), jnp.float32)
    bt3 = 0.1 * jax.random.normal(ks[8], (out_c,), jnp.float32)
    s3, b3 = bn_fold(g3, bt3)

    return dict(w_expand=w_expand, s1=s1, b1=b1,
                w_dw=w_dw, s2=s2, b2=b2,
                w_proj=w_proj, s3=s3, b3=b3)


if __name__ == "__main__":
    key = jax.random.PRNGKey(0)
    configs = [
        # (in_c, out_c, stride, expand_ratio, N, H, W)
        (8, 8, 1, 6, 2, 16, 16),    # expansion + residual shortcut
        (8, 16, 2, 6, 2, 16, 16),   # expansion + stride 2 (no shortcut)
        (16, 16, 1, 1, 2, 16, 16),  # no expansion + residual shortcut
    ]
    for cfg_i, (in_c, out_c, stride, er, n, hgt, wid) in enumerate(configs):
        kx, kp, key = jax.random.split(key, 3)
        x = jax.random.normal(kx, (n, in_c, hgt, wid), jnp.float32)
        params = make_params(kp, in_c, out_c, er)

        out = inverted_residual_forward(x, params, stride=stride,
                                        expand_ratio=er)
        out = jax.block_until_ready(out)

        ref = reference_forward(x, params, stride=stride, expand_ratio=er)
        h_o = (hgt - 1) // stride + 1
        w_o = (wid - 1) // stride + 1
        assert out.shape == (n, out_c, h_o, w_o), (cfg_i, out.shape)
        # bf16 MXU operands (f32 accumulation) -> loosened tolerance vs f32 ref
        max_err = float(jnp.max(jnp.abs(out - ref)))
        assert jnp.allclose(out, ref, atol=3e-2, rtol=3e-2), (cfg_i, max_err)

    print("KERNEL_OK")
</pallas_src>

<mosaic_0001>
module attributes {stable_mosaic.version = 11 : i64} {
  func.func @_fused_ir_kernel(%arg0: i32, %arg1: i32, %arg2: memref<1x18x32x8xbf16, #tpu.memory_space<vmem>>, %arg3: memref<8x48xbf16, #tpu.memory_space<vmem>>, %arg4: memref<1x48xf32, #tpu.memory_space<vmem>>, %arg5: memref<1x48xf32, #tpu.memory_space<vmem>>, %arg6: memref<9x48xf32, #tpu.memory_space<vmem>>, %arg7: memref<1x48xf32, #tpu.memory_space<vmem>>, %arg8: memref<1x48xf32, #tpu.memory_space<vmem>>, %arg9: memref<48x8xbf16, #tpu.memory_space<vmem>>, %arg10: memref<1x8xf32, #tpu.memory_space<vmem>>, %arg11: memref<1x8xf32, #tpu.memory_space<vmem>>, %arg12: memref<1x8x16x8xf32, #tpu.memory_space<vmem>>, %arg13: memref<1x8x16x8xf32, #tpu.memory_space<vmem>>) attributes {dimension_semantics = [#tpu.dimension_semantics<parallel>, #tpu.dimension_semantics<parallel>], iteration_bounds = array<i64: 2, 2>, scalar_prefetch = 0 : i64, scratch_operands = 0 : i64, tpu.core_type = #tpu.core_type<tc>, window_params = [{transform_indices = @transform_0, window_bounds = array<i64: 1, 18, 32, 8>}, {pipeline_mode = #tpu.pipeline_mode<synchronous>, transform_indices = @transform_1, window_bounds = array<i64: 8, 48>}, {pipeline_mode = #tpu.pipeline_mode<synchronous>, transform_indices = @transform_2, window_bounds = array<i64: 1, 48>}, {pipeline_mode = #tpu.pipeline_mode<synchronous>, transform_indices = @transform_3, window_bounds = array<i64: 1, 48>}, {pipeline_mode = #tpu.pipeline_mode<synchronous>, transform_indices = @transform_4, window_bounds = array<i64: 9, 48>}, {pipeline_mode = #tpu.pipeline_mode<synchronous>, transform_indices = @transform_5, window_bounds = array<i64: 1, 48>}, {pipeline_mode = #tpu.pipeline_mode<synchronous>, transform_indices = @transform_6, window_bounds = array<i64: 1, 48>}, {pipeline_mode = #tpu.pipeline_mode<synchronous>, transform_indices = @transform_7, window_bounds = array<i64: 48, 8>}, {pipeline_mode = #tpu.pipeline_mode<synchronous>, transform_indices = @transform_8, window_bounds = array<i64: 1, 8>}, {pipeline_mode = #tpu.pipeline_mode<synchronous>, transform_indices = @transform_9, window_bounds = array<i64: 1, 8>}, {transform_indices = @transform_10, window_bounds = array<i64: 1, 8, 16, 8>}, {transform_indices = @transform_11, window_bounds = array<i64: 1, 8, 16, 8>}]} {
    %c8_i32 = arith.constant 8 : i32
    %0 = arith.muli %arg1, %c8_i32 : i32
    %1 = tpu.assume_multiple %0, 8 : i32
    %c0 = arith.constant 0 : index
    %2 = arith.index_cast %1 : i32 to index
    %c0_0 = arith.constant 0 : index
    %c0_1 = arith.constant 0 : index
    %3 = vector.load %arg2[%c0, %2, %c0_0, %c0_1] : memref<1x18x32x8xbf16, #tpu.memory_space<vmem>>, vector<1x10x32x8xbf16>
    %4 = vector.shape_cast %3 : vector<1x10x32x8xbf16> to vector<10x32x8xbf16>
    %5 = vector.shape_cast %4 : vector<10x32x8xbf16> to vector<320x8xbf16>
    %c0_2 = arith.constant 0 : index
    %c0_3 = arith.constant 0 : index
    %6 = vector.load %arg3[%c0_2, %c0_3] : memref<8x48xbf16, #tpu.memory_space<vmem>>, vector<8x48xbf16>
    %cst = arith.constant dense<0.000000e+00> : vector<320x48xf32>
    %7 = tpu.matmul %5, %6, %cst {dimension_numbers = #tpu.dot_dimension_numbers<[1], [0], [0], [1], [0, 0, 1, 1], [], []>} : vector<320x8xbf16>, vector<8x48xbf16>, vector<320x48xf32> -> vector<320x48xf32>
    %c0_4 = arith.constant 0 : index
    %c0_5 = arith.constant 0 : index
    %8 = vector.load %arg4[%c0_4, %c0_5] : memref<1x48xf32, #tpu.memory_space<vmem>>, vector<1x48xf32>
    %9 = vector.shape_cast %8 : vector<1x48xf32> to vector<48xf32>
    %10 = vector.shape_cast %9 : vector<48xf32> to vector<1x48xf32>
    %11 = vector.broadcast %10 : vector<1x48xf32> to vector<320x48xf32>
    %12 = arith.mulf %7, %11 : vector<320x48xf32>
    %c0_6 = arith.constant 0 : index
    %c0_7 = arith.constant 0 : index
    %13 = vector.load %arg5[%c0_6, %c0_7] : memref<1x48xf32, #tpu.memory_space<vmem>>, vector<1x48xf32>
    %14 = vector.shape_cast %13 : vector<1x48xf32> to vector<48xf32>
    %15 = vector.shape_cast %14 : vector<48xf32> to vector<1x48xf32>
    %16 = vector.broadcast %15 : vector<1x48xf32> to vector<320x48xf32>
    %17 = arith.addf %12, %16 : vector<320x48xf32>
    %cst_8 = arith.constant 0.000000e+00 : f32
    %cst_9 = arith.constant 6.000000e+00 : f32
    %18 = vector.broadcast %cst_8 : f32 to vector<320x48xf32>
    %19 = arith.maximumf %18, %17 : vector<320x48xf32>
    %20 = vector.broadcast %cst_9 : f32 to vector<320x48xf32>
    %21 = arith.minimumf %20, %19 : vector<320x48xf32>
    %22 = vector.shape_cast %21 : vector<320x48xf32> to vector<10x32x48xf32>
    %23 = tpu.iota {dimensions = array<i32: 0>} : vector<10x32x48xi32>
    %24 = vector.broadcast %1 : i32 to vector<10x32x48xi32>
    %25 = arith.addi %24, %23 : vector<10x32x48xi32>
    %c1_i32 = arith.constant 1 : i32
    %26 = vector.broadcast %c1_i32 : i32 to vector<10x32x48xi32>
    %27 = arith.muli %25, %26 : vector<10x32x48xi32>
    %c0_i32 = arith.constant 0 : i32
    %28 = vector.broadcast %c0_i32 : i32 to vector<10x32x48xi32>
    %29 = arith.addi %27, %28 : vector<10x32x48xi32>
    %30 = tpu.iota {dimensions = array<i32: 1>} : vector<10x32x48xi32>
    %c1_i32_10 = arith.constant 1 : i32
    %31 = vector.broadcast %c1_i32_10 : i32 to vector<10x32x48xi32>
    %32 = arith.muli %30, %31 : vector<10x32x48xi32>
    %c0_i32_11 = arith.constant 0 : i32
    %33 = vector.broadcast %c0_i32_11 : i32 to vector<10x32x48xi32>
    %34 = arith.addi %32, %33 : vector<10x32x48xi32>
    %c1_i32_12 = arith.constant 1 : i32
    %35 = vector.broadcast %c1_i32_12 : i32 to vector<10x32x48xi32>
    %36 = arith.cmpi sge, %29, %35 : vector<10x32x48xi32>
    %c16_i32 = arith.constant 16 : i32
    %37 = vector.broadcast %c16_i32 : i32 to vector<10x32x48xi32>
    %38 = arith.cmpi sle, %29, %37 : vector<10x32x48xi32>
    %39 = arith.andi %36, %38 : vector<10x32x48xi1>
    %c1_i32_13 = arith.constant 1 : i32
    %40 = vector.broadcast %c1_i32_13 : i32 to vector<10x32x48xi32>
    %41 = arith.cmpi sge, %34, %40 : vector<10x32x48xi32>
    %42 = arith.andi %39, %41 : vector<10x32x48xi1>
    %c16_i32_14 = arith.constant 16 : i32
    %43 = vector.broadcast %c16_i32_14 : i32 to vector<10x32x48xi32>
    %44 = arith.cmpi sle, %34, %43 : vector<10x32x48xi32>
    %45 = arith.andi %42, %44 : vector<10x32x48xi1>
    %cst_15 = arith.constant 0.000000e+00 : f32
    %46 = vector.broadcast %cst_15 : f32 to vector<10x32x48xf32>
    %47 = arith.select %45, %22, %46 : vector<10x32x48xi1>, vector<10x32x48xf32>
    %cst_16 = arith.constant 0.000000e+00 : f32
    %48 = vector.broadcast %cst_16 : f32 to vector<8x16x48xf32>
    %49 = vector.extract_strided_slice %47 {offsets = [0, 0, 0], sizes = [8, 16, 48], strides = [1, 1, 1]} : vector<10x32x48xf32> to vector<8x16x48xf32>
    %c0_17 = arith.constant 0 : index
    %c0_18 = arith.constant 0 : index
    %50 = vector.load %arg6[%c0_17, %c0_18] : memref<9x48xf32, #tpu.memory_space<vmem>>, vector<1x48xf32>
    %51 = vector.shape_cast %50 : vector<1x48xf32> to vector<48xf32>
    %52 = vector.shape_cast %51 : vector<48xf32> to vector<1x1x48xf32>
    %53 = vector.broadcast %52 : vector<1x1x48xf32> to vector<8x16x48xf32>
    %54 = arith.mulf %49, %53 : vector<8x16x48xf32>
    %55 = arith.addf %48, %54 : vector<8x16x48xf32>
    %56 = vector.extract_strided_slice %47 {offsets = [0, 1, 0], sizes = [8, 16, 48], strides = [1, 1, 1]} : vector<10x32x48xf32> to vector<8x16x48xf32>
    %c1 = arith.constant 1 : index
    %c0_19 = arith.constant 0 : index
    %57 = vector.load %arg6[%c1, %c0_19] : memref<9x48xf32, #tpu.memory_space<vmem>>, vector<1x48xf32>
    %58 = vector.shape_cast %57 : vector<1x48xf32> to vector<48xf32>
    %59 = vector.shape_cast %58 : vector<48xf32> to vector<1x1x48xf32>
    %60 = vector.broadcast %59 : vector<1x1x48xf32> to vector<8x16x48xf32>
    %61 = arith.mulf %56, %60 : vector<8x16x48xf32>
    %62 = arith.addf %55, %61 : vector<8x16x48xf32>
    %63 = vector.extract_strided_slice %47 {offsets = [0, 2, 0], sizes = [8, 16, 48], strides = [1, 1, 1]} : vector<10x32x48xf32> to vector<8x16x48xf32>
    %c2 = arith.constant 2 : index
    %c0_20 = arith.constant 0 : index
    %64 = vector.load %arg6[%c2, %c0_20] : memref<9x48xf32, #tpu.memory_space<vmem>>, vector<1x48xf32>
    %65 = vector.shape_cast %64 : vector<1x48xf32> to vector<48xf32>
    %66 = vector.shape_cast %65 : vector<48xf32> to vector<1x1x48xf32>
    %67 = vector.broadcast %66 : vector<1x1x48xf32> to vector<8x16x48xf32>
    %68 = arith.mulf %63, %67 : vector<8x16x48xf32>
    %69 = arith.addf %62, %68 : vector<8x16x48xf32>
    %70 = vector.extract_strided_slice %47 {offsets = [1, 0, 0], sizes = [8, 16, 48], strides = [1, 1, 1]} : vector<10x32x48xf32> to vector<8x16x48xf32>
    %c3 = arith.constant 3 : index
    %c0_21 = arith.constant 0 : index
    %71 = vector.load %arg6[%c3, %c0_21] : memref<9x48xf32, #tpu.memory_space<vmem>>, vector<1x48xf32>
    %72 = vector.shape_cast %71 : vector<1x48xf32> to vector<48xf32>
    %73 = vector.shape_cast %72 : vector<48xf32> to vector<1x1x48xf32>
    %74 = vector.broadcast %73 : vector<1x1x48xf32> to vector<8x16x48xf32>
    %75 = arith.mulf %70, %74 : vector<8x16x48xf32>
    %76 = arith.addf %69, %75 : vector<8x16x48xf32>
    %77 = vector.extract_strided_slice %47 {offsets = [1, 1, 0], sizes = [8, 16, 48], strides = [1, 1, 1]} : vector<10x32x48xf32> to vector<8x16x48xf32>
    %c4 = arith.constant 4 : index
    %c0_22 = arith.constant 0 : index
    %78 = vector.load %arg6[%c4, %c0_22] : memref<9x48xf32, #tpu.memory_space<vmem>>, vector<1x48xf32>
    %79 = vector.shape_cast %78 : vector<1x48xf32> to vector<48xf32>
    %80 = vector.shape_cast %79 : vector<48xf32> to vector<1x1x48xf32>
    %81 = vector.broadcast %80 : vector<1x1x48xf32> to vector<8x16x48xf32>
    %82 = arith.mulf %77, %81 : vector<8x16x48xf32>
    %83 = arith.addf %76, %82 : vector<8x16x48xf32>
    %84 = vector.extract_strided_slice %47 {offsets = [1, 2, 0], sizes = [8, 16, 48], strides = [1, 1, 1]} : vector<10x32x48xf32> to vector<8x16x48xf32>
    %c5 = arith.constant 5 : index
    %c0_23 = arith.constant 0 : index
    %85 = vector.load %arg6[%c5, %c0_23] : memref<9x48xf32, #tpu.memory_space<vmem>>, vector<1x48xf32>
    %86 = vector.shape_cast %85 : vector<1x48xf32> to vector<48xf32>
    %87 = vector.shape_cast %86 : vector<48xf32> to vector<1x1x48xf32>
    %88 = vector.broadcast %87 : vector<1x1x48xf32> to vector<8x16x48xf32>
    %89 = arith.mulf %84, %88 : vector<8x16x48xf32>
    %90 = arith.addf %83, %89 : vector<8x16x48xf32>
    %91 = vector.extract_strided_slice %47 {offsets = [2, 0, 0], sizes = [8, 16, 48], strides = [1, 1, 1]} : vector<10x32x48xf32> to vector<8x16x48xf32>
    %c6 = arith.constant 6 : index
    %c0_24 = arith.constant 0 : index
    %92 = vector.load %arg6[%c6, %c0_24] : memref<9x48xf32, #tpu.memory_space<vmem>>, vector<1x48xf32>
    %93 = vector.shape_cast %92 : vector<1x48xf32> to vector<48xf32>
    %94 = vector.shape_cast %93 : vector<48xf32> to vector<1x1x48xf32>
    %95 = vector.broadcast %94 : vector<1x1x48xf32> to vector<8x16x48xf32>
    %96 = arith.mulf %91, %95 : vector<8x16x48xf32>
    %97 = arith.addf %90, %96 : vector<8x16x48xf32>
    %98 = vector.extract_strided_slice %47 {offsets = [2, 1, 0], sizes = [8, 16, 48], strides = [1, 1, 1]} : vector<10x32x48xf32> to vector<8x16x48xf32>
    %c7 = arith.constant 7 : index
    %c0_25 = arith.constant 0 : index
    %99 = vector.load %arg6[%c7, %c0_25] : memref<9x48xf32, #tpu.memory_space<vmem>>, vector<1x48xf32>
    %100 = vector.shape_cast %99 : vector<1x48xf32> to vector<48xf32>
    %101 = vector.shape_cast %100 : vector<48xf32> to vector<1x1x48xf32>
    %102 = vector.broadcast %101 : vector<1x1x48xf32> to vector<8x16x48xf32>
    %103 = arith.mulf %98, %102 : vector<8x16x48xf32>
    %104 = arith.addf %97, %103 : vector<8x16x48xf32>
    %105 = vector.extract_strided_slice %47 {offsets = [2, 2, 0], sizes = [8, 16, 48], strides = [1, 1, 1]} : vector<10x32x48xf32> to vector<8x16x48xf32>
    %c8 = arith.constant 8 : index
    %c0_26 = arith.constant 0 : index
    %106 = vector.load %arg6[%c8, %c0_26] : memref<9x48xf32, #tpu.memory_space<vmem>>, vector<1x48xf32>
    %107 = vector.shape_cast %106 : vector<1x48xf32> to vector<48xf32>
    %108 = vector.shape_cast %107 : vector<48xf32> to vector<1x1x48xf32>
    %109 = vector.broadcast %108 : vector<1x1x48xf32> to vector<8x16x48xf32>
    %110 = arith.mulf %105, %109 : vector<8x16x48xf32>
    %111 = arith.addf %104, %110 : vector<8x16x48xf32>
    %c0_27 = arith.constant 0 : index
    %c0_28 = arith.constant 0 : index
    %112 = vector.load %arg7[%c0_27, %c0_28] : memref<1x48xf32, #tpu.memory_space<vmem>>, vector<1x48xf32>
    %113 = vector.shape_cast %112 : vector<1x48xf32> to vector<48xf32>
    %114 = vector.shape_cast %113 : vector<48xf32> to vector<1x1x48xf32>
    %115 = vector.broadcast %114 : vector<1x1x48xf32> to vector<8x16x48xf32>
    %116 = arith.mulf %111, %115 : vector<8x16x48xf32>
    %c0_29 = arith.constant 0 : index
    %c0_30 = arith.constant 0 : index
    %117 = vector.load %arg8[%c0_29, %c0_30] : memref<1x48xf32, #tpu.memory_space<vmem>>, vector<1x48xf32>
    %118 = vector.shape_cast %117 : vector<1x48xf32> to vector<48xf32>
    %119 = vector.shape_cast %118 : vector<48xf32> to vector<1x1x48xf32>
    %120 = vector.broadcast %119 : vector<1x1x48xf32> to vector<8x16x48xf32>
    %121 = arith.addf %116, %120 : vector<8x16x48xf32>
    %cst_31 = arith.constant 0.000000e+00 : f32
    %cst_32 = arith.constant 6.000000e+00 : f32
    %122 = vector.broadcast %cst_31 : f32 to vector<8x16x48xf32>
    %123 = arith.maximumf %122, %121 : vector<8x16x48xf32>
    %124 = vector.broadcast %cst_32 : f32 to vector<8x16x48xf32>
    %125 = arith.minimumf %124, %123 : vector<8x16x48xf32>
    %126 = vector.shape_cast %125 : vector<8x16x48xf32> to vector<128x48xf32>
    %127 = arith.truncf %126 : vector<128x48xf32> to vector<128x48xbf16>
    %c0_33 = arith.constant 0 : index
    %c0_34 = arith.constant 0 : index
    %128 = vector.load %arg9[%c0_33, %c0_34] : memref<48x8xbf16, #tpu.memory_space<vmem>>, vector<48x8xbf16>
    %cst_35 = arith.constant dense<0.000000e+00> : vector<128x8xf32>
    %129 = tpu.matmul %127, %128, %cst_35 {dimension_numbers = #tpu.dot_dimension_numbers<[1], [0], [0], [1], [0, 0, 1, 1], [], []>} : vector<128x48xbf16>, vector<48x8xbf16>, vector<128x8xf32> -> vector<128x8xf32>
    %c0_36 = arith.constant 0 : index
    %c0_37 = arith.constant 0 : index
    %130 = vector.load %arg10[%c0_36, %c0_37] : memref<1x8xf32, #tpu.memory_space<vmem>>, vector<1x8xf32>
    %131 = vector.shape_cast %130 : vector<1x8xf32> to vector<8xf32>
    %132 = vector.shape_cast %131 : vector<8xf32> to vector<1x8xf32>
    %133 = vector.broadcast %132 : vector<1x8xf32> to vector<128x8xf32>
    %134 = arith.mulf %129, %133 : vector<128x8xf32>
    %c0_38 = arith.constant 0 : index
    %c0_39 = arith.constant 0 : index
    %135 = vector.load %arg11[%c0_38, %c0_39] : memref<1x8xf32, #tpu.memory_space<vmem>>, vector<1x8xf32>
    %136 = vector.shape_cast %135 : vector<1x8xf32> to vector<8xf32>
    %137 = vector.shape_cast %136 : vector<8xf32> to vector<1x8xf32>
    %138 = vector.broadcast %137 : vector<1x8xf32> to vector<128x8xf32>
    %139 = arith.addf %134, %138 : vector<128x8xf32>
    %140 = vector.shape_cast %139 : vector<128x8xf32> to vector<8x16x8xf32>
    %c0_40 = arith.constant 0 : index
    %c0_41 = arith.constant 0 : index
    %c0_42 = arith.constant 0 : index
    %c0_43 = arith.constant 0 : index
    %141 = vector.load %arg12[%c0_40, %c0_41, %c0_42, %c0_43] : memref<1x8x16x8xf32, #tpu.memory_space<vmem>>, vector<1x8x16x8xf32>
    %142 = vector.shape_cast %141 : vector<1x8x16x8xf32> to vector<8x16x8xf32>
    %143 = arith.addf %140, %142 : vector<8x16x8xf32>
    %c0_44 = arith.constant 0 : index
    %c0_45 = arith.constant 0 : index
    %c0_46 = arith.constant 0 : index
    %c0_47 = arith.constant 0 : index
    %144 = vector.load %arg13[%c0_44, %c0_45, %c0_46, %c0_47] : memref<1x8x16x8xf32, #tpu.memory_space<vmem>>, vector<1x8x16x8xf32>
    %145 = vector.shape_cast %144 : vector<1x8x16x8xf32> to vector<8x16x8xf32>
    %146 = vector.shape_cast %143 : vector<8x16x8xf32> to vector<1x8x16x8xf32>
    tpu.vector_store %arg13[%c0_44, %c0_45, %c0_46, %c0_47], %146 {strides = array<i32>} : memref<1x8x16x8xf32, #tpu.memory_space<vmem>>, vector<1x8x16x8xf32>,
    return
  }
  func.func @transform_0(%arg0: i32, %arg1: i32) -> (i32, i32, i32, i32) {
    %c0_i32 = arith.constant 0 : i32
    %c0_i32_0 = arith.constant 0 : i32
    %c0_i32_1 = arith.constant 0 : i32
    %c0_i32_2 = arith.constant 0 : i32
    return %arg0, %c0_i32, %c0_i32_0, %c0_i32_1 : i32, i32, i32, i32
  }
  func.func @transform_1(%arg0: i32, %arg1: i32) -> (i32, i32) {
    %c0_i32 = arith.constant 0 : i32
    %c0_i32_0 = arith.constant 0 : i32
    %c0_i32_1 = arith.constant 0 : i32
    return %c0_i32, %c0_i32_0 : i32, i32
  }
  func.func @transform_2(%arg0: i32, %arg1: i32) -> (i32, i32) {
    %c0_i32 = arith.constant 0 : i32
    %c0_i32_0 = arith.constant 0 : i32
    %c0_i32_1 = arith.constant 0 : i32
    return %c0_i32, %c0_i32_0 : i32, i32
  }
  func.func @transform_3(%arg0: i32, %arg1: i32) -> (i32, i32) {
    %c0_i32 = arith.constant 0 : i32
    %c0_i32_0 = arith.constant 0 : i32
    %c0_i32_1 = arith.constant 0 : i32
    return %c0_i32, %c0_i32_0 : i32, i32
  }
  func.func @transform_4(%arg0: i32, %arg1: i32) -> (i32, i32) {
    %c0_i32 = arith.constant 0 : i32
    %c0_i32_0 = arith.constant 0 : i32
    %c0_i32_1 = arith.constant 0 : i32
    return %c0_i32, %c0_i32_0 : i32, i32
  }
  func.func @transform_5(%arg0: i32, %arg1: i32) -> (i32, i32) {
    %c0_i32 = arith.constant 0 : i32
    %c0_i32_0 = arith.constant 0 : i32
    %c0_i32_1 = arith.constant 0 : i32
    return %c0_i32, %c0_i32_0 : i32, i32
  }
  func.func @transform_6(%arg0: i32, %arg1: i32) -> (i32, i32) {
    %c0_i32 = arith.constant 0 : i32
    %c0_i32_0 = arith.constant 0 : i32
    %c0_i32_1 = arith.constant 0 : i32
    return %c0_i32, %c0_i32_0 : i32, i32
  }
  func.func @transform_7(%arg0: i32, %arg1: i32) -> (i32, i32) {
    %c0_i32 = arith.constant 0 : i32
    %c0_i32_0 = arith.constant 0 : i32
    %c0_i32_1 = arith.constant 0 : i32
    return %c0_i32, %c0_i32_0 : i32, i32
  }
  func.func @transform_8(%arg0: i32, %arg1: i32) -> (i32, i32) {
    %c0_i32 = arith.constant 0 : i32
    %c0_i32_0 = arith.constant 0 : i32
    %c0_i32_1 = arith.constant 0 : i32
    return %c0_i32, %c0_i32_0 : i32, i32
  }
  func.func @transform_9(%arg0: i32, %arg1: i32) -> (i32, i32) {
    %c0_i32 = arith.constant 0 : i32
    %c0_i32_0 = arith.constant 0 : i32
    %c0_i32_1 = arith.constant 0 : i32
    return %c0_i32, %c0_i32_0 : i32, i32
  }
  func.func @transform_10(%arg0: i32, %arg1: i32) -> (i32, i32, i32, i32) {
    %c0_i32 = arith.constant 0 : i32
    %c0_i32_0 = arith.constant 0 : i32
    %c0_i32_1 = arith.constant 0 : i32
    return %arg0, %arg1, %c0_i32, %c0_i32_0 : i32, i32, i32, i32
  }
  func.func @transform_11(%arg0: i32, %arg1: i32) -> (i32, i32, i32, i32) {
    %c0_i32 = arith.constant 0 : i32
    %c0_i32_0 = arith.constant 0 : i32
    %c0_i32_1 = arith.constant 0 : i32
    return %arg0, %arg1, %c0_i32, %c0_i32_0 : i32, i32, i32, i32
  }
}

</mosaic_0001>

<bundles_post_ra>
// kernel: tpu_custom_call.1
= control target key start
LH: loop header
LB: loop body
LE: loop exit
PB: predicated region body
PF: predicated region fallthrough
CT: control target
= control target key end

     0   :  { %s2780_s17 = smov 0   ;;  %s2782_s18 = smov 0   ;;  %s4473_s0 = inlined_call_operand.vmem [shape: bf16[2,18,32,8], index: 0, kind: input, shape index: {}]   ;;  %s4474_s1 = inlined_call_operand.vmem [shape: bf16[8,48], index: 1, kind: input, shape index: {}]   ;;  %s4475_s2 = inlined_call_operand.vmem [shape: f32[1,48], index: 2, kind: input, shape index: {}]   ;;  %s4476_s3 = inlined_call_operand.vmem [shape: f32[1,48], index: 3, kind: input, shape index: {}]   ;;  %s4477_s4 = inlined_call_operand.vmem [shape: f32[9,48], index: 4, kind: input, shape index: {}]   ;;  %s4478_s5 = inlined_call_operand.vmem [shape: f32[1,48], index: 5, kind: input, shape index: {}]   ;;  %s4479_s6 = inlined_call_operand.vmem [shape: f32[1,48], index: 6, kind: input, shape index: {}]   ;;  %s4480_s7 = inlined_call_operand.vmem [shape: bf16[48,8], index: 7, kind: input, shape index: {}]   ;;  %s4481_s8 = inlined_call_operand.vmem [shape: f32[1,8], index: 8, kind: input, shape index: {}]   ;;  %s4482_s9 = inlined_call_operand.vmem [shape: f32[1,8], index: 9, kind: input, shape index: {}]   ;;  %s4483_s10 = inlined_call_operand.vmem [shape: f32[2,16,16,8], index: 10, kind: input, shape index: {}]   ;;  %s4484_s11 = inlined_call_operand.vmem [shape: f32[2,16,16,8], index: 11, kind: output, shape index: {}]  }
   0x1   :  { %s2784_s19 = smov 0   ;;  %s2786_s20 = smov 0  }
   0x2   :  { %s2788_s21 = smov 0  }
   0x3 LB: > { %s30_s22 = sadd.s32 1, %s2710_s19  ;;  %s33_s23 = sadd.s32 1, %s2714_s20  ;;  %s2718_s21 = sphi %s2788_s21, %s21_s21   ;;  %s2714_s20 = sphi %s2786_s20, %s4863_s20   ;;  %s2710_s19 = sphi %s2784_s19, %s4862_s19   ;;  %s2706_s18 = sphi %s2782_s18, %s4861_s18   ;;  %s2702_s17 = sphi %s2780_s17, %s4860_s17  }
   0x4   : > { %p31_p0 = scmp.ge.s32.totalorder %s30_s22, 2  ;;  %p2425_p1 = scmp.ge.s32.totalorder %s2718_s21, 1 }
   0x5   : > { %p369_p2 = scmp.lt.s32.totalorder %s2718_s21, 5 }
   0x6   : > { %s4865_s22 = smov (%p31_p0, %s30_s22), 0  ;;  %s4867_s23 = smov (!%p31_p0, %s33_s23), %s2714_s20 }
   0x7   : > { %p370_p3 = pnand %p2425_p1, %p369_p2  ;;  %p35_p4 = scmp.ge.s32.totalorder %s4867_s23, 2 }
   0x9   : > { %s4869_s23 = smov (%p35_p4, %s4867_s23), 0  ;;  %373 = sbr.rel (%p370_p3) target bundleno = 681 (0x2a9), region = 64 }
  0x10   : > { %v496_v0 = vld [vmem:[%s4474_s1] sm:$0xf]  ;;  %vm658_vm0 = vcmask 1043456   ;;  %p424_p5 = scmp.lt.s32.totalorder %s2706_s18, 1  ;;  %s2507_s27 = sshll.u32 %s2702_s17, 7  ;;  %vm597_vm1 = vcmask 64512   ;;  %v989_v24 = vlaneseq }
  0x11   : > { %2606 = vmatprep.subr.msk.bf16.mxu0 %vm658_vm0, %v496_v0  ;;  %v660_v1 = vsel %vm658_vm0, %v496_v0, 0  ;;  %2607 = vmatprep.subr.msk.bf16.mxu1 %vm658_vm0, %v496_v0  ;;  %v2669_v22 = vld [vmem:[%s4480_s7] sm:$0xff]   ;;  %v2670_v23 = vld [vmem:[%s4480_s7 + $0x8] sm:$0xff]   ;;  %s2871_s24 = sshll.u32 %s2702_s17, 3  ;;  %v2671_v29 = vld [vmem:[%s4480_s7 + $0x10] sm:$0xff]   ;;  %vm1209_vm8 = vcmask 1046528  }
  0x12   : > { %2541 = vmatpush3.bf16.msra.mxu0 %v660_v1  ;;  %s4871_s18 = smov (!%p424_p5, %s2706_s18), 1  ;;  %2605 = vmatpush3.bf16.msra.mxu1 %v660_v1  ;;  %v2873_v25 = vshrl.u32 %v989_v24, 7  ;;  %v979_v26 = vstv %s2871_s24  ;;  %v2879_v27 = vld [vmem:[%s4475_s2] ss:$0 sm:$0xff]  ;;  %v2914_v44 = vld [vmem:[%s4477_s4 + $0x1] ss:$0 sm:$0xff] }
  0x13   : > { %s2608_s26 = smul.u32 288, %s4871_s18  ;;  %2582 = vmatprep.subr.bf16.mxu1 %v2669_v22  ;;  %v2890_v31 = vld [vmem:[%s4476_s3] ss:$0 sm:$0xff]  ;;  %vm993_vm2 = vcmp.ge.s32.totalorder %v979_v26, 1  ;;  %vm1003_vm3 = vcmp.le.s32.totalorder %v979_v26, 16  ;;  %v980_v36 = vadd.s32 1, %v979_v26 }
  0x14   : > { %v2882_v28 = vadd.s32 16, %v2873_v25  ;;  %vm2895_vm4 = vmand %vm993_vm2, %vm1003_vm3  ;;  %vm1023_vm6 = vcmp.ge.s32.totalorder %v2873_v25, 1  ;;  %v2920_v48 = vld [vmem:[%s4477_s4 + $0x2] ss:$0 sm:$0xff]  ;;  %vm1335_vm12 = vcmask 1045504   ;;  %v2930_v50 = vadd.s32 2, %v979_v26 }
  0x15   : > { %s428_s30 = scalar_lea.vmem %s4473_s0, %s2608_s26  ;;  %vm994_vm9 = vcmp.ge.s32.totalorder %v980_v36, 1  ;;  %vm1004_vm10 = vcmp.le.s32.totalorder %v980_v36, 16  ;;  %vm2926_vm11 = vmand %vm2895_vm4, %vm1023_vm6  ;;  %v2932_v51 = vadd.s32 3, %v979_v26  ;;  %v2934_v52 = vadd.s32 4, %v979_v26  ;;  %v2945_v59 = vld [vmem:[%s4477_s4] ss:$0 sm:$0xff] }
  0x16   : > { %s2822_s12 = scalar_lea.vmem %s428_s30, %s2507_s27  ;;  %vm1058_vm5 = vcmp.le.s32.totalorder %v2882_v28, 16  ;;  %v2936_v56 = vadd.s32 5, %v979_v26  ;;  %v2938_v57 = vadd.s32 7, %v979_v26  ;;  %v2948_v62 = vadd.s32 8, %v979_v26  ;;  %vm2968_vm13 = vmand %vm994_vm9, %vm1004_vm10  ;;  %p432_p6 = scmp.lt.s32.totalorder %s2871_s24, 15 }
  0x17   : > { %v2649_v2 = vld [vmem:[%s2822_s12] sm:$0xff]   ;;  %v2650_v3 = vld [vmem:[%s2822_s12 + $0x8] sm:$0xff]   ;;  %v2651_v4 = vld [vmem:[%s2822_s12 + $0x10] sm:$0xff]   ;;  %v2950_v63 = vadd.s32 6, %v979_v26  ;;  %vm995_vm0 = vcmp.ge.s32.totalorder %v2930_v50, 1  ;;  %vm1005_vm2 = vcmp.le.s32.totalorder %v2930_v50, 16 }
  0x18   : > { %2542 = vmatprep.mubr.msk.bf16.mxu0 %vm597_vm1, %v2649_v2  ;;  %v2652_v5 = vld [vmem:[%s2822_s12 + $0x18] sm:$0xff]   ;;  %v2653_v6 = vld [vmem:[%s2822_s12 + $0x20] sm:$0xff]   ;;  %v2659_v7 = vld [vmem:[%s2822_s12 + $0x70] sm:$0xff]   ;;  %s4873_s24 = smov (!%p432_p6, %s2871_s24), 15  ;;  %s2429_s14 = sshll.u32 %s4871_s18, 5 }
  0x19   : > { %2543 = vmatmul.mubr.msk.bf16.vlgmr.msra.gmra.mrb[0].mxu0 %vm597_vm1, %v2650_v3  ;;  %v2660_v8 = vld [vmem:[%s2822_s12 + $0x78] sm:$0xff]   ;;  %2570 = vmatprep.mubr.msk.bf16.mxu1 %vm597_vm1, %v2659_v7  ;;  %v2663_v9 = vld [vmem:[%s2822_s12 + $0x80] sm:$0xff]   ;;  %v2654_v10 = vld [vmem:[%s2822_s12 + $0x28] sm:$0xff]   ;;  %s2428_s13 = sshll.u32 %s4873_s24, 1 }
  0x1a   : > { %2546 = vmatprep.mubr.msk.bf16.mxu0 %vm597_vm1, %v2651_v4  ;;  %2571 = vmatmul.mubr.msk.bf16.vlgmr.msra.gmra.mrb[0].mxu1 %vm597_vm1, %v2660_v8  ;;  %v2655_v11 = vld [vmem:[%s2822_s12 + $0x30] sm:$0xff]   ;;  %v2664_v12 = vld [vmem:[%s2822_s12 + $0x88] sm:$0xff]   ;;  %v2656_v14 = vld [vmem:[%s2822_s12 + $0x38] sm:$0xff]   ;;  %s436_s15 = sadd.s32 %s2429_s14, %s2428_s13 }
  0x1b   : > { %2574 = vmatprep.mubr.msk.bf16.mxu1 %vm597_vm1, %v2663_v9  ;;  %v2667_v13 = vld [vmem:[%s2822_s12 + $0x90] sm:$0xff]   ;;  %v2657_v15 = vld [vmem:[%s2822_s12 + $0x40] sm:$0xff]   ;;  %v2668_v16 = vld [vmem:[%s2822_s12 + $0x98] sm:$0xff]   ;;  %2583 = vmatpush3.bf16.msra.mxu1 %v2669_v22  ;;  %s2430_s16 = sshll.u32 %s436_s15, 3 }
  0x1c   : > { %v2658_v17 = vld [vmem:[%s2822_s12 + $0x48] sm:$0xff]   ;;  %v2661_v18 = vld [vmem:[%s2822_s12 + $0x50] sm:$0xff]   ;;  %v2662_v19 = vld [vmem:[%s2822_s12 + $0x58] sm:$0xff]   ;;  %2584 = vmatprep.subr.bf16.mxu1 %v2670_v23  ;;  %s4366_s29 = scalar_lea.vmem %s4483_s10, %s2430_s16 }
  0x1d   : > { %v2665_v20 = vld [vmem:[%s2822_s12 + $0x60] sm:$0xff]   ;;  %v2666_v21 = vld [vmem:[%s2822_s12 + $0x68] sm:$0xff]   ;;  %vm2907_vm7 = vmand %vm2895_vm4, %vm1058_vm5  ;;  %s4382_s12 = scalar_lea.vmem %s4484_s11, %s2430_s16 }
  0x1e   : > { %vm2986_vm14 = vmand %vm2968_vm13, %vm1058_vm5 }
  0x1f   : > { %2585 = vmatpush3.bf16.msra.mxu1 %v2670_v23  ;;  %vm3013_vm15 = vmand %vm2968_vm13, %vm1023_vm6 }
  0x20   : > { %2586 = vmatprep.subr.bf16.mxu1 %v2671_v29  ;;  %vm3068_vm3 = vmand %vm995_vm0, %vm1005_vm2  ;;  %vm1000_vm2 = vcmp.ge.s32.totalorder %v2938_v57, 1 }
  0x21   : > { %2547 = vmatmul.mubr.msk.bf16.gmra.mrb[4].mxu0 %vm597_vm1, %v2652_v5  ;;  %vm1067_vm9 = vmand %vm3068_vm3, %vm1058_vm5 }
  0x22   : > { %2550 = vmatprep.mubr.msk.bf16.mxu0 %vm597_vm1, %v2653_v6  ;;  %2575 = vmatmul.mubr.msk.bf16.gmra.mrb[4].mxu1 %vm597_vm1, %v2664_v12  ;;  %vm1032_vm10 = vmand %vm3068_vm3, %vm1023_vm6 }
  0x23   : > { %2578 = vmatprep.mubr.msk.bf16.mxu1 %vm597_vm1, %v2667_v13  ;;  %2587 = vmatpush3.bf16.msra.mxu1 %v2671_v29 }
  0x29   : > { %2551 = vmatmul.mubr.msk.bf16.gmra.mrb[8].mxu0 %vm597_vm1, %v2654_v10 }
  0x2a   : > { %2554 = vmatprep.mubr.msk.bf16.mxu0 %vm597_vm1, %v2655_v11  ;;  %2579 = vmatmul.mubr.msk.bf16.gmra.mrb[8].mxu1 %vm597_vm1, %v2668_v16  ;;  %v2959_v11 = vadd.s32 9, %v979_v26 }
  0x31   : > { %2555 = vmatmul.mubr.msk.bf16.gmra.mrb[12].mxu0 %vm597_vm1, %v2656_v14 }
  0x32   : > { %2558 = vmatprep.mubr.msk.bf16.mxu0 %vm597_vm1, %v2657_v15 }
  0x39   : > { %2559 = vmatmul.mubr.msk.bf16.gmra.mrb[16].mxu0 %vm597_vm1, %v2658_v17 }
  0x3a   : > { %2562 = vmatprep.mubr.msk.bf16.mxu0 %vm597_vm1, %v2661_v18 }
  0x41   : > { %2563 = vmatmul.mubr.msk.bf16.gmra.mrb[20].mxu0 %vm597_vm1, %v2662_v19 }
  0x42   : > { %2566 = vmatprep.mubr.msk.bf16.mxu0 %vm597_vm1, %v2665_v20 }
  0x49   : > { %2567 = vmatmul.mubr.msk.bf16.gmra.mrb[24].mxu0 %vm597_vm1, %v2666_v21 }
  0xec   : > { %v2544_v30 = vpop.f32.mrb[0].mxu0 }
  0xed   : > { %v854_v32 = vmul.f32 %v2544_v30, %v2879_v27  ;;  %v696_v33 = vpop.f32.mrb[1].mxu0  ;;  %v2572_v5 = vpop.f32.mrb[0].mxu1 }
  0xee   : > { %v852_v34 = vmul.f32 %v2879_v27, %v696_v33  ;;  %v2545_v35 = vpop.f32.mrb[2].mxu0  ;;  %v801_v10 = vpop.f32.mrb[1].mxu1  ;;  %v2977_v33 = vmul.f32 %v2572_v5, %v2879_v27 }
  0xef   : > { %v891_v37 = vadd.f32 %v2890_v31, %v854_v32  ;;  %v699_v39 = vpop.f32.mrb[3].mxu0  ;;  %v2573_v16 = vpop.f32.mrb[2].mxu1 }
  0xf0   : > { %v889_v40 = vadd.f32 %v2890_v31, %v852_v34  ;;  %v853_v41 = vmul.f32 %v2879_v27, %v699_v39  ;;  %v804_v22 = vpop.f32.mrb[3].mxu1  ;;  %v2980_v34 = vmul.f32 %v2879_v27, %v801_v10 }
  0xf1   : > { %v921_v42 = vmax.f32 %v891_v37, 0.0 }
  0xf2   : > { %v919_v45 = vmax.f32 %v889_v40, 0.0  ;;  %v890_v46 = vadd.f32 %v2890_v31, %v853_v41 }
  0xf3   : > { %v951_v47 = vmin.f32 %v921_v42, 6.0 }
  0xf4   : > { %v949_v53 = vmin.f32 %v919_v45, 6.0  ;;  %v920_v54 = vmax.f32 %v890_v46, 0.0  ;;  %v2548_v55 = vpop.f32.mrb[4].mxu0  ;;  %v2995_v46 = vmul.f32 %v2879_v27, %v804_v22 }
  0xf5   : > { %v1091_v58 = vsel %vm2907_vm7, %v951_v47, 0.0  ;;  %v857_v60 = vmul.f32 %v2548_v55, %v2879_v27  ;;  %v711_v61 = vpop.f32.mrb[5].mxu0  ;;  %v3002_v55 = vld [vmem:[%s4477_s4 + $0x4] ss:$0 sm:$0xff]  ;;  %vm1006_vm7 = vcmp.le.s32.totalorder %v2932_v51, 16 }
  0xf6   : > { %v1163_v0 = vmul.f32 %v2914_v44, %v1091_v58  ;;  %v1289_v1 = vmul.f32 %v2920_v48, %v1091_v58  ;;  %v1089_v2 = vsel %vm2926_vm11, %v949_v53, 0.0  ;;  %v950_v3 = vmin.f32 %v920_v54, 6.0  ;;  %v2549_v4 = vpop.f32.mrb[6].mxu0  ;;  %v3007_v58 = vld [vmem:[%s4477_s4 + $0x5] ss:$0 sm:$0xff] }
  0xf7   : > { %v1161_v6 = vmul.f32 %v2914_v44, %v1089_v2  ;;  %v1287_v7 = vmul.f32 %v2920_v48, %v1089_v2  ;;  %v894_v8 = vadd.f32 %v2890_v31, %v857_v60  ;;  %v714_v9 = vpop.f32.mrb[7].mxu0  ;;  %v1124_v13 = vmul.f32 %v2945_v59, %v1089_v2 }
  0xf8   : > { %v1213_v12 = vrot.slane %v1163_v0, 1  ;;  %v1090_v14 = vsel %vm2895_vm4, %v950_v3, 0.0  ;;  %v855_v15 = vmul.f32 %v2879_v27, %v711_v61  ;;  %v1339_v17 = vrot.slane %v1289_v1, 2  ;;  %v3019_v0 = vpop.f32.mrb[4].mxu1 }
  0xf9   : > { %v1210_v18 = vrot.slane %v1161_v6, 1  ;;  %v1336_v19 = vrot.slane %v1287_v7, 2  ;;  %v1162_v20 = vmul.f32 %v2914_v44, %v1090_v14  ;;  %v1288_v23 = vmul.f32 %v2920_v48, %v1090_v14  ;;  %v3026_v6 = vpop.f32.mrb[5].mxu1 }
  0xfa   : > { %v924_v24 = vmax.f32 %v894_v8, 0.0  ;;  %v892_v26 = vadd.f32 %v2890_v31, %v855_v15  ;;  %v856_v29 = vmul.f32 %v2879_v27, %v714_v9  ;;  %v1125_v30 = vmul.f32 %v2945_v59, %v1090_v14 }
  0xfb   : > { %v1211_v32 = vrot.slane %v1162_v20, 1  ;;  %v1337_v35 = vrot.slane %v1288_v23, 2  ;;  %vm996_vm4 = vcmp.ge.s32.totalorder %v2932_v51, 1 }
  0xfc   : > { %v954_v36 = vmin.f32 %v924_v24, 6.0  ;;  %v922_v38 = vmax.f32 %v892_v26, 0.0  ;;  %v893_v39 = vadd.f32 %v2890_v31, %v856_v29  ;;  %v2552_v40 = vpop.f32.mrb[8].mxu0  ;;  %vm3186_vm11 = vmand %vm996_vm4, %vm1006_vm7  ;;  %vm998_vm7 = vcmp.ge.s32.totalorder %v2936_v56, 1 }
  0xfd   : > { %v1212_v41 = vsel %vm1209_vm8, %v1210_v18, %v1211_v32  ;;  %v1214_v42 = vsel %vm1209_vm8, %v1211_v32, %v1213_v12  ;;  %v860_v43 = vmul.f32 %v2552_v40, %v2879_v27  ;;  %v726_v45 = vpop.f32.mrb[9].mxu0  ;;  %v1338_v53 = vsel %vm1335_vm12, %v1336_v19, %v1337_v35  ;;  %v3033_v12 = vld [vmem:[%s4477_s4 + $0x3] ss:$0 sm:$0xff]  ;;  %vm1035_vm0 = vmand %vm3186_vm11, %vm1023_vm6 }
  0xfe   : > { %v1266_v47 = vadd.f32 %v1212_v41, %v1124_v13  ;;  %v1267_v49 = vadd.f32 %v1214_v42, %v1125_v30  ;;  %v1340_v54 = vsel %vm1335_vm12, %v1337_v35, %v1339_v17  ;;  %v2553_v61 = vpop.f32.mrb[10].mxu0  ;;  %v1094_v1 = vsel %vm2986_vm14, %v954_v36, 0.0  ;;  %v2577_v13 = vpop.f32.mrb[6].mxu1 }
  0xff   : > { %v952_v2 = vmin.f32 %v922_v38, 6.0  ;;  %v923_v3 = vmax.f32 %v893_v39, 0.0  ;;  %v3024_v4 = vadd.f32 %v2890_v31, %v860_v43  ;;  %v729_v5 = vpop.f32.mrb[11].mxu0  ;;  %v1166_v9 = vmul.f32 %v2914_v44, %v1094_v1  ;;  %v3039_v18 = vpop.f32.mrb[7].mxu1 }
 0x100   : > { %v1392_v7 = vadd.f32 %v1338_v53, %v1266_v47  ;;  %v1393_v8 = vadd.f32 %v1340_v54, %v1267_v49  ;;  %v1292_v10 = vmul.f32 %v2920_v48, %v1094_v1  ;;  %v1452_v14 = vmul.f32 %v3002_v55, %v1094_v1  ;;  %v3053_v61 = vpop.f32.mrb[8].mxu1 }
 0x101   : > { %v1577_v15 = vmul.f32 %v3007_v58, %v1094_v1  ;;  %v1092_v16 = vsel %vm3013_vm15, %v952_v2, 0.0  ;;  %v953_v17 = vmin.f32 %v923_v3, 6.0  ;;  %v1218_v19 = vrot.slane %v1166_v9, 1  ;;  %4569 = vst [vmem:[#allocation2_spill] sm:$0xff] %v3053_v61  ;;  %v3058_v9 = vpop.f32.mrb[9].mxu1 }
 0x102   : > { %v1344_v20 = vrot.slane %v1292_v10, 2  ;;  %v1126_v22 = vmul.f32 %v2945_v59, %v1092_v16  ;;  %v1164_v23 = vmul.f32 %v2914_v44, %v1092_v16  ;;  %v1501_v24 = vrot.slane %v1452_v14, 1  ;;  %4570 = vst [vmem:[#allocation3_spill] sm:$0xff] %v3058_v9 }
 0x103   : > { %v1626_v26 = vrot.slane %v1577_v15, 2  ;;  %v1290_v29 = vmul.f32 %v2920_v48, %v1092_v16  ;;  %v1413_v30 = vmul.f32 %v3033_v12, %v1092_v16  ;;  %v1450_v35 = vmul.f32 %v3002_v55, %v1092_v16 }
 0x104   : > { %v1215_v32 = vrot.slane %v1164_v23, 1  ;;  %v1575_v36 = vmul.f32 %v3007_v58, %v1092_v16  ;;  %v1093_v37 = vsel %vm2968_vm13, %v953_v17, 0.0  ;;  %v2556_v38 = vpop.f32.mrb[12].mxu0  ;;  %v927_v3 = vmax.f32 %v3024_v4, 0.0  ;;  %v2581_v16 = vpop.f32.mrb[10].mxu1  ;;  %vm1070_vm13 = vmand %vm3186_vm11, %vm1058_vm5 }
 0x105   : > { %v1341_v39 = vrot.slane %v1290_v29, 2  ;;  %v1429_v40 = vadd.f32 %v1413_v30, %v1392_v7  ;;  %v1127_v41 = vmul.f32 %v2945_v59, %v1093_v37  ;;  %v1165_v42 = vmul.f32 %v2914_v44, %v1093_v37  ;;  %v741_v43 = vpop.f32.mrb[13].mxu0 }
 0x106   : > { %v1498_v47 = vrot.slane %v1450_v35, 1  ;;  %v1623_v49 = vrot.slane %v1575_v36, 2  ;;  %v1291_v53 = vmul.f32 %v2920_v48, %v1093_v37  ;;  %v1414_v54 = vmul.f32 %v3033_v12, %v1093_v37  ;;  %v2557_v60 = vpop.f32.mrb[14].mxu0 }
 0x107   : > { %v1216_v1 = vrot.slane %v1165_v42, 1  ;;  %v1451_v21 = vmul.f32 %v3002_v55, %v1093_v37  ;;  %v1576_v2 = vmul.f32 %v3007_v58, %v1093_v37  ;;  %v744_v7 = vpop.f32.mrb[15].mxu0  ;;  %v858_v14 = vmul.f32 %v2879_v27, %v726_v45 }
 0x108   : > { %v1342_v10 = vrot.slane %v1291_v53, 2  ;;  %v1430_v13 = vadd.f32 %v1414_v54, %v1393_v8  ;;  %v859_v15 = vmul.f32 %v2879_v27, %v729_v5  ;;  %v3072_v8 = vpop.f32.mrb[11].mxu1  ;;  %v957_v42 = vmin.f32 %v927_v3, 6.0  ;;  %v3110_v54 = vld [vmem:[%s4477_s4 + $0x8] ss:$0 sm:$0xff] }
 0x109   : > { %v1217_v17 = vsel %vm1209_vm8, %v1215_v32, %v1216_v1  ;;  %v1219_v23 = vsel %vm1209_vm8, %v1216_v1, %v1218_v19  ;;  %v1499_v29 = vrot.slane %v1451_v21, 1  ;;  %v1624_v30 = vrot.slane %v1576_v2, 2  ;;  %4573 = vst [vmem:[#allocation4_spill] sm:$0xff] %v3072_v8 }
 0x10a   : > { %v1268_v45 = vadd.f32 %v1217_v17, %v1126_v22  ;;  %v1269_v35 = vadd.f32 %v1219_v23, %v1127_v41  ;;  %v1343_v5 = vsel %vm1335_vm12, %v1341_v39, %v1342_v10  ;;  %v1345_v32 = vsel %vm1335_vm12, %v1342_v10, %v1344_v20 }
 0x10b   : > { %v1500_v19 = vsel %vm1209_vm8, %v1498_v47, %v1499_v29  ;;  %v1502_v36 = vsel %vm1209_vm8, %v1499_v29, %v1501_v24  ;;  %v3079_v37 = vsel %vm1335_vm12, %v1623_v49, %v1624_v30  ;;  %v3082_v50 = vsel %vm1335_vm12, %v1624_v30, %v1626_v26 }
 0x10c   : > { %v1394_v22 = vadd.f32 %v1343_v5, %v1268_v45  ;;  %v3086_v41 = vadd.f32 %v1345_v32, %v1269_v35  ;;  %v3088_v39 = vadd.f32 %v1500_v19, %v1429_v40  ;;  %v3090_v20 = vadd.f32 %v1502_v36, %v1430_v13  ;;  %v2560_v24 = vpop.f32.mrb[16].mxu0  ;;  %v3105_v40 = vld [vmem:[%s4477_s4 + $0x7] ss:$0 sm:$0xff] }
 0x10d   : > { %v895_v26 = vadd.f32 %v2890_v31, %v858_v14  ;;  %v896_v47 = vadd.f32 %v2890_v31, %v859_v15  ;;  %v756_v49 = vpop.f32.mrb[17].mxu0  ;;  %v3100_v53 = vadd.f32 %v2890_v31, %v2977_v33  ;;  %v863_v60 = vmul.f32 %v2556_v38, %v2879_v27 }
 0x10e   : > { %v861_v1 = vmul.f32 %v2879_v27, %v741_v43  ;;  %v862_v21 = vmul.f32 %v2879_v27, %v744_v7  ;;  %v3116_v2 = vmul.f32 %v2560_v24, %v2879_v27  ;;  %v2561_v33 = vpop.f32.mrb[18].mxu0  ;;  %v1097_v3 = vsel %vm1067_vm9, %v957_v42, 0.0 }
 0x10f   : > { %v925_v10 = vmax.f32 %v895_v26, 0.0  ;;  %v926_v13 = vmax.f32 %v896_v47, 0.0  ;;  %v3119_v14 = vmul.f32 %v2879_v27, %v756_v49  ;;  %v3121_v15 = vpop.f32.mrb[19].mxu0  ;;  %v1169_v16 = vmul.f32 %v2914_v44, %v1097_v3 }
 0x110   : > { %v3125_v38 = vmul.f32 %v2920_v48, %v1097_v3  ;;  %v1455_v43 = vmul.f32 %v3002_v55, %v1097_v3  ;;  %v3129_v7 = vmul.f32 %v3007_v58, %v1097_v3  ;;  %v3136_v17 = vmul.f32 %v3105_v40, %v1097_v3 }
 0x111   : > { %v3139_v23 = vmul.f32 %v3110_v54, %v1097_v3  ;;  %v955_v29 = vmin.f32 %v925_v10, 6.0  ;;  %v956_v30 = vmin.f32 %v926_v13, 6.0  ;;  %v1223_v45 = vrot.slane %v1169_v16, 1 }
 0x112   : > { %4574 = vst [vmem:[#allocation5_spill] sm:$0xff] %v3125_v38  ;;  %4575 = vst [vmem:[#allocation6_spill] sm:$0xff] %v3136_v17  ;;  %v1506_v5 = vrot.slane %v1455_v43, 1  ;;  %v900_v32 = vadd.f32 %v2890_v31, %v863_v60  ;;  %vm997_vm14 = vcmp.ge.s32.totalorder %v2934_v52, 1  ;;  %vm1007_vm15 = vcmp.le.s32.totalorder %v2934_v52, 16 }
 0x113   : > { %4576 = vst [vmem:[#allocation7_spill] sm:$0xff] %v3139_v23  ;;  %v3145_v24 = vsel %vm1032_vm10, %v955_v29, 0.0  ;;  %v3149_v42 = vsel %vm3068_vm3, %v956_v30, 0.0  ;;  %vm1010_vm3 = vcmp.le.s32.totalorder %v2938_v57, 16  ;;  %vm3307_vm4 = vmand %vm997_vm14, %vm1007_vm15  ;;  %vm1008_vm9 = vcmp.le.s32.totalorder %v2936_v56, 16 }
 0x114   : > { %v3154_v47 = vmul.f32 %v2914_v44, %v3145_v24  ;;  %v3158_v49 = vmul.f32 %v2920_v48, %v3145_v24  ;;  %v1415_v60 = vmul.f32 %v3033_v12, %v3145_v24  ;;  %v3162_v33 = vpop.f32.mrb[20].mxu0  ;;  %v3166_v4 = vmul.f32 %v2945_v59, %v3145_v24  ;;  %vm1073_vm10 = vmand %vm3307_vm4, %vm1058_vm5 }
 0x115   : > { %v1453_v3 = vmul.f32 %v3002_v55, %v3145_v24  ;;  %v1578_v10 = vmul.f32 %v3007_v58, %v3145_v24  ;;  %v3174_v13 = vmul.f32 %v2914_v44, %v3149_v42  ;;  %v3176_v16 = vpop.f32.mrb[21].mxu0  ;;  %v1129_v35 = vmul.f32 %v2945_v59, %v3149_v42  ;;  %vm3427_vm14 = vmand %vm998_vm7, %vm1008_vm9 }
 0x116   : > { %4577 = vst [vmem:[#allocation8_spill] sm:$0xff] %v3154_v47  ;;  %4578 = vst [vmem:[#allocation9_spill] sm:$0xff] %v3158_v49  ;;  %v1431_v30 = vadd.f32 %v1415_v60, %v1394_v22  ;;  %v2565_v36 = vpop.f32.mrb[22].mxu0  ;;  %v3193_v43 = vmul.f32 %v2920_v48, %v3149_v42  ;;  %v1416_v22 = vmul.f32 %v3033_v12, %v3149_v42  ;;  %vm999_vm9 = vcmp.ge.s32.totalorder %v2950_v63, 1 }
 0x117   : > { %4579 = vst [vmem:[#allocation10_spill] sm:$0xff] %v3166_v4  ;;  %4580 = vst [vmem:[#allocation11_spill] sm:$0xff] %v3174_v13  ;;  %v1503_v19 = vrot.slane %v1453_v3, 1  ;;  %v4488_v38 = vrot.slane %v3174_v13, 1  ;;  %v3197_v60 = vpop.f32.mrb[23].mxu0  ;;  %v1628_v29 = vrot.slane %v1578_v10, 2  ;;  %v1454_v51 = vmul.f32 %v3002_v55, %v3149_v42 }
 0x118   : > { %4583 = vst [vmem:[#allocation12_spill] sm:$0xff] %v3193_v43  ;;  %v1579_v4 = vmul.f32 %v3007_v58, %v3149_v42  ;;  %v930_v36 = vmax.f32 %v900_v32, 0.0  ;;  %v1432_v49 = vadd.f32 %v1416_v22, %v3086_v41  ;;  %v898_v10 = vadd.f32 %v2890_v31, %v861_v1  ;;  %vm1041_vm7 = vmand %vm3427_vm14, %vm1023_vm6 }
 0x119   : > { %v1224_v3 = vsel %vm1209_vm8, %v4488_v38, %v1223_v45  ;;  %v899_v47 = vadd.f32 %v2890_v31, %v862_v21  ;;  %v1504_v9 = vrot.slane %v1454_v51, 1  ;;  %v3220_v38 = vadd.f32 %v2890_v31, %v3116_v2 }
 0x11a   : > { %v3213_v8 = vadd.f32 %v1224_v3, %v1129_v35  ;;  %v1629_v61 = vrot.slane %v1579_v4, 2  ;;  %v960_v32 = vmin.f32 %v930_v36, 6.0  ;;  %v928_v45 = vmax.f32 %v898_v10, 0.0 }
 0x11b   : > { %v929_v22 = vmax.f32 %v899_v47, 0.0  ;;  %v1505_v1 = vsel %vm1209_vm8, %v1503_v19, %v1504_v9  ;;  %v1507_v21 = vsel %vm1209_vm8, %v1504_v9, %v1506_v5  ;;  %v869_v26 = vmul.f32 %v3162_v33, %v2879_v27 }
 0x11c   : > { %4584 = vst [vmem:[#allocation13_spill] sm:$0xff] %v3213_v8  ;;  %v1100_v35 = vsel %vm1070_vm13, %v960_v32, 0.0  ;;  %v1630_v4 = vsel %vm1335_vm12, %v1628_v29, %v1629_v61  ;;  %v3225_v51 = vpop.f32.mrb[24].mxu0  ;;  %v1557_v36 = vadd.f32 %v1507_v21, %v1432_v49  ;;  %v958_v49 = vmin.f32 %v928_v45, 6.0  ;;  %vm3401_vm13 = vmand %vm1000_vm2, %vm1010_vm3 }
 0x11d   : > { %v3228_v3 = vmul.f32 %v2914_v44, %v1100_v35  ;;  %v3231_v10 = vmul.f32 %v2920_v48, %v1100_v35  ;;  %v3234_v47 = vmul.f32 %v3002_v55, %v1100_v35  ;;  %v3240_v9 = vpop.f32.mrb[25].mxu0  ;;  %v3243_v2 = vmul.f32 %v3007_v58, %v1100_v35  ;;  %vm1082_vm15 = vmand %vm3401_vm13, %vm1058_vm5 }
 0x11e   : > { %v3246_v5 = vmul.f32 %v3105_v40, %v1100_v35  ;;  %v3249_v19 = vmul.f32 %v3110_v54, %v1100_v35  ;;  %v2569_v29 = vpop.f32.mrb[26].mxu0  ;;  %v1556_v41 = vadd.f32 %v1505_v1, %v1431_v30  ;;  %v901_v8 = vadd.f32 %v2890_v31, %v3119_v14  ;;  %v3273_v14 = vld [vmem:[%s4477_s4 + $0x6] ss:$0 sm:$0xff] }
 0x11f   : > { %4585 = vst [vmem:[#allocation14_spill] sm:$0xff] %v3231_v10  ;;  %4586 = vst [vmem:[#allocation15_spill] sm:$0xff] %v3234_v47  ;;  %v1228_v32 = vrot.slane %v3228_v3, 1  ;;  %v3255_v43 = vpop.f32.mrb[27].mxu0  ;;  %v1098_v35 = vsel %vm1035_vm0, %v958_v49, 0.0  ;;  %v959_v47 = vmin.f32 %v929_v22, 6.0  ;;  %v910_v56 = vadd.f32 %v2890_v31, %v2980_v34 }
 0x120   : > { %4587 = vst [vmem:[#allocation16_spill] sm:$0xff] %v3243_v2  ;;  %v3262_v29 = vmul.f32 %v2945_v59, %v1098_v35  ;;  %v3265_v3 = vmul.f32 %v2914_v44, %v1098_v35  ;;  %v3268_v30 = vmul.f32 %v2920_v48, %v1098_v35  ;;  %v3276_v1 = vmul.f32 %v3033_v12, %v1098_v35  ;;  %vm1076_vm0 = vmand %vm3427_vm14, %vm1058_vm5 }
 0x121   : > { %v3279_v49 = vmul.f32 %v3002_v55, %v1098_v35  ;;  %v1681_v21 = vadd.f32 %v1630_v4, %v1556_v41  ;;  %v1702_v23 = vmul.f32 %v3273_v14, %v1098_v35  ;;  %v3284_v45 = vmul.f32 %v3007_v58, %v1098_v35 }
 0x122   : > { %4588 = vst [vmem:[#allocation17_spill] sm:$0xff] %v3262_v29  ;;  %4589 = vst [vmem:[#allocation18_spill] sm:$0xff] %v3265_v3  ;;  %v3287_v17 = vmul.f32 %v3105_v40, %v1098_v35  ;;  %v3290_v10 = vmul.f32 %v3110_v54, %v1098_v35  ;;  %v4594_v41 = vrot.slane %v3129_v7, 2  ;;  %v933_v35 = vmax.f32 %v3220_v38, 0.0 }
 0x123   : > { %4590 = vst [vmem:[#allocation19_spill] sm:$0xff] %v3268_v30  ;;  %4591 = vst [vmem:[#allocation20_spill] sm:$0xff] %v3276_v1  ;;  %v3293_v2 = vadd.f32 %v1702_v23, %v1681_v21  ;;  %v1099_v7 = vsel %vm3186_vm11, %v959_v47, 0.0  ;;  %v931_v22 = vmax.f32 %v901_v8, 0.0  ;;  %v865_v21 = vmul.f32 %v2879_v27, %v3121_v15 }
 0x124   : > { %4592 = vst [vmem:[#allocation21_spill] sm:$0xff] %v3279_v49  ;;  %4593 = vst [vmem:[#allocation22_spill] sm:$0xff] %v3284_v45  ;;  %v1632_v4 = vsel %vm1335_vm12, %v1629_v61, %v4594_v41  ;;  %v1131_v38 = vmul.f32 %v2945_v59, %v1099_v7  ;;  %v3320_v52 = vmul.f32 %v2914_v44, %v1099_v7  ;;  %v963_v13 = vmin.f32 %v933_v35, 6.0 }
 0x125   : > { %v1682_v45 = vadd.f32 %v1632_v4, %v1557_v36  ;;  %v3323_v36 = vmul.f32 %v2920_v48, %v1099_v7  ;;  %v3328_v8 = vmul.f32 %v3033_v12, %v1099_v7  ;;  %v3331_v15 = vmul.f32 %v3002_v55, %v1099_v7  ;;  %vm1038_vm11 = vmand %vm3307_vm4, %vm1023_vm6 }
 0x126   : > { %4597 = vst [vmem:[#allocation23_spill] sm:$0xff] %v3320_v52  ;;  %v1703_v47 = vmul.f32 %v3273_v14, %v1099_v7  ;;  %v3335_v41 = vmul.f32 %v3105_v40, %v1099_v7  ;;  %v4502_v4 = vrot.slane %v3320_v52, 1  ;;  %v3344_v29 = vmul.f32 %v3007_v58, %v1099_v7 }
 0x127   : > { %4598 = vst [vmem:[#allocation24_spill] sm:$0xff] %v3323_v36  ;;  %4599 = vst [vmem:[#allocation25_spill] sm:$0xff] %v3328_v8  ;;  %v3350_v30 = vmul.f32 %v3110_v54, %v1099_v7  ;;  %v961_v8 = vmin.f32 %v931_v22, 6.0  ;;  %v1103_v35 = vsel %vm1073_vm10, %v963_v13, 0.0  ;;  %v902_v61 = vadd.f32 %v2890_v31, %v865_v21 }
 0x128   : > { %4600 = vst [vmem:[#allocation26_spill] sm:$0xff] %v3331_v15  ;;  %4601 = vst [vmem:[#allocation27_spill] sm:$0xff] %v3344_v29  ;;  %v3347_v3 = vadd.f32 %v1703_v47, %v1682_v45  ;;  %v1229_v33 = vsel %vm1209_vm8, %v4502_v4, %v1228_v32  ;;  %v3364_v7 = vmul.f32 %v2914_v44, %v1103_v35  ;;  %vm1001_vm2 = vcmp.ge.s32.totalorder %v2948_v62, 1 }
 0x129   : > { %v3361_v45 = vadd.f32 %v1229_v33, %v1131_v38  ;;  %v3367_v22 = vmul.f32 %v2920_v48, %v1103_v35  ;;  %v3370_v47 = vmul.f32 %v3002_v55, %v1103_v35  ;;  %v3373_v52 = vmul.f32 %v3007_v58, %v1103_v35 }
 0x12a   : > { %v3376_v32 = vmul.f32 %v3105_v40, %v1103_v35  ;;  %v3379_v13 = vmul.f32 %v3110_v54, %v1103_v35  ;;  %v3381_v21 = vsel %vm1038_vm11, %v961_v8, 0.0  ;;  %v1233_v33 = vrot.slane %v3364_v7, 1 }
 0x12b   : > { %4602 = vst [vmem:[#allocation28_spill] sm:$0xff] %v3361_v45  ;;  %4603 = vst [vmem:[#allocation29_spill] sm:$0xff] %v3367_v22  ;;  %v3391_v1 = vmul.f32 %v2945_v59, %v3381_v21  ;;  %v3395_v8 = vmul.f32 %v2914_v44, %v3381_v21  ;;  %v3408_v4 = vmul.f32 %v2920_v48, %v3381_v21  ;;  %v932_v29 = vmax.f32 %v902_v61, 0.0 }
 0x12c   : > { %4604 = vst [vmem:[#allocation30_spill] sm:$0xff] %v3370_v47  ;;  %4605 = vst [vmem:[#allocation31_spill] sm:$0xff] %v3373_v52  ;;  %v3412_v45 = vmul.f32 %v3033_v12, %v3381_v21  ;;  %v3416_v36 = vmul.f32 %v3002_v55, %v3381_v21  ;;  %v3420_v57 = vmul.f32 %v3007_v58, %v3381_v21  ;;  %v942_v22 = vmax.f32 %v3100_v53, 0.0 }
 0x12d   : > { %4606 = vst [vmem:[#allocation32_spill] sm:$0xff] %v3376_v32  ;;  %4607 = vst [vmem:[#allocation33_spill] sm:$0xff] %v3379_v13  ;;  %v906_v38 = vadd.f32 %v2890_v31, %v869_v26  ;;  %v867_v61 = vmul.f32 %v2879_v27, %v3176_v16  ;;  %v962_v26 = vmin.f32 %v932_v29, 6.0  ;;  %v868_v53 = vmul.f32 %v2879_v27, %v3197_v60 }
 0x12e   : > { %4608 = vst [vmem:[#allocation34_spill] sm:$0xff] %v3381_v21  ;;  %4609 = vst [vmem:[#allocation35_spill] sm:$0xff] %v3391_v1  ;;  %v972_v47 = vmin.f32 %v942_v22, 6.0  ;;  %v3452_v16 = vadd.f32 %v2890_v31, %v2995_v46  ;;  %v878_v22 = vmul.f32 %v3019_v0, %v2879_v27  ;;  %vm1011_vm3 = vcmp.le.s32.totalorder %v2948_v62, 16 }
 0x12f   : > { %4610 = vst [vmem:[#allocation36_spill] sm:$0xff] %v3395_v8  ;;  %4613 = vst [vmem:[#allocation37_spill] sm:$0xff] %v3408_v4  ;;  %v904_v52 = vadd.f32 %v2890_v31, %v867_v61  ;;  %v940_v4 = vmax.f32 %v910_v56, 0.0  ;;  %v3456_v34 = vsel %vm3307_vm4, %v962_v26, 0.0  ;;  %v905_v23 = vadd.f32 %v2890_v31, %v868_v53 }
 0x130   : > { %4614 = vst [vmem:[#allocation38_spill] sm:$0xff] %v3412_v45  ;;  %4615 = vst [vmem:[#allocation39_spill] sm:$0xff] %v3416_v36  ;;  %v1112_v60 = vsel %vm1082_vm15, %v972_v47, 0.0  ;;  %v3464_v61 = vmul.f32 %v2914_v44, %v3456_v34  ;;  %v3468_v46 = vmul.f32 %v2920_v48, %v3456_v34  ;;  %v3477_v0 = vmul.f32 %v3002_v55, %v3456_v34 }
 0x131   : > { %4616 = vst [vmem:[#allocation40_spill] sm:$0xff] %v3420_v57  ;;  %v936_v57 = vmax.f32 %v906_v38, 0.0  ;;  %4619 = vst [vmem:[#allocation41_spill] sm:$0xff] %v3456_v34  ;;  %v1133_v38 = vmul.f32 %v2945_v59, %v3456_v34  ;;  %v3481_v47 = vmul.f32 %v3007_v58, %v3456_v34  ;;  %v3491_v8 = vmul.f32 %v2914_v44, %v1112_v60 }
 0x132   : > { %4620 = vst [vmem:[#allocation42_spill] sm:$0xff] %v3464_v61  ;;  %4621 = vst [vmem:[#allocation43_spill] sm:$0xff] %v3468_v46  ;;  %v4521_v26 = vrot.slane %v3464_v61, 1  ;;  %v970_v61 = vmin.f32 %v940_v4, 6.0  ;;  %vm1009_vm10 = vcmp.le.s32.totalorder %v2950_v63, 16 }
 0x133   : > { %v966_v29 = vmin.f32 %v936_v57, 6.0  ;;  %v3473_v57 = vmul.f32 %v3033_v12, %v3456_v34  ;;  %4623 = vst [vmem:[#allocation45_spill] sm:$0xff] %v3481_v47  ;;  %v934_v34 = vmax.f32 %v904_v52, 0.0  ;;  %vm1047_vm4 = vmand %vm3401_vm13, %vm1023_vm6  ;;  %v915_v52 = vadd.f32 %v2890_v31, %v878_v22 }
 0x134   : > { %v1234_v47 = vsel %vm1209_vm8, %v4521_v26, %v1233_v33  ;;  %v3521_v33 = vmul.f32 %v2920_v48, %v1112_v60  ;;  %v935_v26 = vmax.f32 %v905_v23, 0.0  ;;  %v3551_v49 = vsel %vm1047_vm4, %v970_v61, 0.0  ;;  %vm3608_vm11 = vmand %vm1001_vm2, %vm1011_vm3 }
 0x135   : > { %4622 = vst [vmem:[#allocation44_spill] sm:$0xff] %v3473_v57  ;;  %v1106_v56 = vsel %vm1076_vm0, %v966_v29, 0.0  ;;  %v3513_v32 = vadd.f32 %v1234_v47, %v1133_v38  ;;  %v3530_v38 = vmul.f32 %v3105_v40, %v1112_v60  ;;  %v3533_v47 = vmul.f32 %v3110_v54, %v1112_v60  ;;  %vm3693_vm15 = vmand %vm3608_vm11, %vm1023_vm6 }
 0x136   : > { %v3485_v1 = vmul.f32 %v2914_v44, %v1106_v56  ;;  %v3488_v53 = vmul.f32 %v2920_v48, %v1106_v56  ;;  %v3495_v36 = vmul.f32 %v3002_v55, %v1106_v56  ;;  %v3498_v45 = vmul.f32 %v3007_v58, %v1106_v56 }
 0x137   : > { %v3501_v29 = vmul.f32 %v3105_v40, %v1106_v56  ;;  %v3511_v46 = vmul.f32 %v3110_v54, %v1106_v56  ;;  %4627 = vst [vmem:[#allocation49_spill] sm:$0xff] %v3513_v32  ;;  %v3527_v56 = vmul.f32 %v3007_v58, %v1112_v60  ;;  %4630 = vst [vmem:[#allocation52_spill] sm:$0xff] %v3530_v38  ;;  %v964_v13 = vmin.f32 %v934_v34, 6.0 }
 0x138   : > { %4624 = vst [vmem:[#allocation46_spill] sm:$0xff] %v3488_v53  ;;  %4625 = vst [vmem:[#allocation47_spill] sm:$0xff] %v3495_v36  ;;  %v1238_v57 = vrot.slane %v3485_v1, 1  ;;  %v3524_v1 = vmul.f32 %v3002_v55, %v1112_v60  ;;  %v965_v53 = vmin.f32 %v935_v26, 6.0  ;;  %v3558_v23 = vmul.f32 %v3033_v12, %v3551_v49 }
 0x139   : > { %4626 = vst [vmem:[#allocation48_spill] sm:$0xff] %v3498_v45  ;;  %4629 = vst [vmem:[#allocation51_spill] sm:$0xff] %v3527_v56  ;;  %v941_v45 = vmax.f32 %v3452_v16, 0.0  ;;  %v3554_v4 = vsel %vm1041_vm7, %v964_v13, 0.0  ;;  %v3562_v34 = vmul.f32 %v3002_v55, %v3551_v49  ;;  %v3579_v16 = vmul.f32 %v3007_v58, %v3551_v49 }
 0x13a   : > { %4628 = vst [vmem:[#allocation50_spill] sm:$0xff] %v3524_v1  ;;  %4631 = vst [vmem:[#allocation53_spill] sm:$0xff] %v3533_v47  ;;  %v3567_v60 = vmul.f32 %v2945_v59, %v3554_v4  ;;  %v3571_v61 = vmul.f32 %v2914_v44, %v3554_v4  ;;  %v3575_v13 = vmul.f32 %v2920_v48, %v3554_v4  ;;  %v3595_v15 = vsel %vm3427_vm14, %v965_v53, 0.0 }
 0x13b   : > { %4632 = vst [vmem:[#allocation54_spill] sm:$0xff] %v3558_v23  ;;  %4633 = vst [vmem:[#allocation55_spill] sm:$0xff] %v3562_v34  ;;  %v3583_v26 = vmul.f32 %v3033_v12, %v3554_v4  ;;  %v3587_v22 = vmul.f32 %v3002_v55, %v3554_v4  ;;  %v3591_v21 = vmul.f32 %v3007_v58, %v3554_v4  ;;  %v971_v34 = vmin.f32 %v941_v45, 6.0 }
 0x13c   : > { %4634 = vst [vmem:[#allocation56_spill] sm:$0xff] %v3567_v60  ;;  %4635 = vst [vmem:[#allocation57_spill] sm:$0xff] %v3571_v61  ;;  %v3602_v1 = vmul.f32 %v2914_v44, %v3595_v15  ;;  %v1135_v53 = vmul.f32 %v2945_v59, %v3595_v15  ;;  %v3621_v23 = vmul.f32 %v3002_v55, %v3595_v15  ;;  %v945_v38 = vmax.f32 %v915_v52, 0.0 }
 0x13d   : > { %4636 = vst [vmem:[#allocation58_spill] sm:$0xff] %v3575_v13  ;;  %4637 = vst [vmem:[#allocation59_spill] sm:$0xff] %v3579_v16  ;;  %v3617_v16 = vmul.f32 %v2920_v48, %v3595_v15  ;;  %v3626_v62 = vmul.f32 %v3033_v12, %v3595_v15  ;;  %v3631_v13 = vmul.f32 %v3007_v58, %v3595_v15  ;;  %v3646_v7 = vsel %vm3401_vm13, %v971_v34, 0.0 }
 0x13e   : > { %4638 = vst [vmem:[#allocation60_spill] sm:$0xff] %v3583_v26  ;;  %4639 = vst [vmem:[#allocation61_spill] sm:$0xff] %v3591_v21  ;;  %v876_v56 = vmul.f32 %v2879_v27, %v3026_v6  ;;  %v872_v60 = vmul.f32 %v3225_v51, %v2879_v27  ;;  %v4646_v45 = vrot.slane %v3602_v1, 1  ;;  %v1679_v61 = vadd.f32 %v3079_v37, %v3088_v39 }
 0x13f   : > { %4640 = vst [vmem:[#allocation62_spill] sm:$0xff] %v3602_v1  ;;  %4643 = vst [vmem:[#allocation63_spill] sm:$0xff] %v3617_v16  ;;  %v975_v16 = vmin.f32 %v945_v38, 6.0  ;;  %v3655_v6 = vmul.f32 %v3033_v12, %v3646_v7  ;;  %v3659_v51 = vmul.f32 %v3002_v55, %v3646_v7  ;;  %v1680_v39 = vadd.f32 %v3082_v50, %v3090_v20 }
 0x140   : > { %4644 = vst [vmem:[#allocation64_spill] sm:$0xff] %v3626_v62  ;;  %4645 = vst [vmem:[#allocation65_spill] sm:$0xff] %v3631_v13  ;;  %v1239_v52 = vsel %vm1209_vm8, %v4646_v45, %v1238_v57  ;;  %v913_v35 = vadd.f32 %v2890_v31, %v876_v56  ;;  %v909_v38 = vadd.f32 %v2890_v31, %v872_v60  ;;  %vm1002_vm2 = vcmp.ge.s32.totalorder %v2959_v11, 1 }
 0x141   : > { %vm1085_vm14 = vmand %vm3608_vm11, %vm1058_vm5  ;;  %v3650_v62 = vadd.f32 %v1239_v52, %v1135_v53  ;;  %4648 = vst [vmem:[#allocation67_spill] sm:$0xff] %v3655_v6  ;;  %v3675_v34 = vmul.f32 %v3007_v58, %v3646_v7  ;;  %v1700_v45 = vmul.f32 %v3273_v14, %v3145_v24  ;;  %v1737_v26 = vmul.f32 %v3105_v40, %v3145_v24 }
 0x142   : > { %4649 = vst [vmem:[#allocation68_spill] sm:$0xff] %v3659_v51  ;;  %v1115_v57 = vsel %vm1085_vm14, %v975_v16, 0.0  ;;  %vm3667_vm13 = vmand %vm999_vm9, %vm1009_vm10  ;;  %v943_v53 = vmax.f32 %v913_v35, 0.0  ;;  %v939_v20 = vmax.f32 %v909_v38, 0.0  ;;  %v1701_v35 = vmul.f32 %v3273_v14, %v3149_v42 }
 0x143   : > { %4647 = vst [vmem:[#allocation66_spill] sm:$0xff] %v3650_v62  ;;  %4652 = vst [vmem:[#allocation69_spill] sm:$0xff] %v3675_v34  ;;  %v3678_v16 = vmul.f32 %v3002_v55, %v1115_v57  ;;  %v3681_v56 = vmul.f32 %v3007_v58, %v1115_v57  ;;  %v3684_v60 = vmul.f32 %v3105_v40, %v1115_v57  ;;  %vm1012_vm3 = vcmp.le.s32.totalorder %v2959_v11, 16 }
 0x144   : > { %v3687_v63 = vmul.f32 %v3110_v54, %v1115_v57  ;;  %vm1079_vm0 = vmand %vm3667_vm13, %vm1058_vm5  ;;  %v973_v38 = vmin.f32 %v943_v53, 6.0  ;;  %v969_v34 = vmin.f32 %v939_v20, 6.0  ;;  %v1716_v62 = vadd.f32 %v1700_v45, %v1679_v61 }
 0x145   : > { %4653 = vst [vmem:[#allocation70_spill] sm:$0xff] %v3684_v60  ;;  %v1717_v52 = vadd.f32 %v1701_v35, %v1680_v39  ;;  %v1738_v57 = vmul.f32 %v3105_v40, %v3149_v42  ;;  %v1862_v21 = vmul.f32 %v3110_v54, %v3145_v24  ;;  %v1863_v53 = vmul.f32 %v3110_v54, %v3149_v42  ;;  %vm3801_vm4 = vmand %vm3667_vm13, %vm1023_vm6 }
 0x146   : > { %4654 = vst [vmem:[#allocation71_spill] sm:$0xff] %v3687_v63  ;;  %v1113_v51 = vsel %vm3693_vm15, %v973_v38, 0.0  ;;  %v1109_v13 = vsel %vm1079_vm0, %v969_v34, 0.0  ;;  %v870_v50 = vmul.f32 %v2879_v27, %v3240_v9  ;;  %v1785_v60 = vrot.slane %v1737_v26, 1  ;;  %v3771_v63 = vld [vmem:[%s4475_s2] ss:$0 sm:$0xff]  ;;  %vm3885_vm9 = vmand %vm1002_vm2, %vm1012_vm3 }
 0x147   : > { %v3721_v61 = vmul.f32 %v3033_v12, %v1113_v51  ;;  %v3724_v39 = vmul.f32 %v3002_v55, %v1113_v51  ;;  %v3727_v20 = vmul.f32 %v3007_v58, %v1113_v51  ;;  %v3732_v34 = vmul.f32 %v3105_v40, %v1113_v51  ;;  %vm3904_vm10 = vmand %vm3885_vm9, %vm1058_vm5 }
 0x148   : > { %v3735_v24 = vmul.f32 %v3110_v54, %v1113_v51  ;;  %v3738_v42 = vmul.f32 %v2914_v44, %v1109_v13  ;;  %v3741_v45 = vmul.f32 %v2920_v48, %v1109_v13  ;;  %v3745_v38 = vmul.f32 %v3273_v14, %v1113_v51  ;;  %vm1053_vm5 = vmand %vm3885_vm9, %vm1023_vm6 }
 0x149   : > { %4657 = vst [vmem:[#allocation72_spill] sm:$0xff] %v3732_v34  ;;  %v3748_v1 = vmul.f32 %v3002_v55, %v1109_v13  ;;  %v3751_v27 = vmul.f32 %v3007_v58, %v1109_v13  ;;  %v3760_v51 = vmul.f32 %v3105_v40, %v1109_v13  ;;  %v1786_v36 = vrot.slane %v1738_v57, 1 }
 0x14a   : > { %4658 = vst [vmem:[#allocation73_spill] sm:$0xff] %v3735_v24  ;;  %4659 = vst [vmem:[#allocation74_spill] sm:$0xff] %v3741_v45  ;;  %v1910_v32 = vrot.slane %v1862_v21, 2  ;;  %v1911_v9 = vrot.slane %v1863_v53, 2  ;;  %v907_v48 = vadd.f32 %v2890_v31, %v870_v50  ;;  %v877_v35 = vmul.f32 %v3771_v63, %v3039_v18  ;;  %v4667_v53 = vld [vmem:[#allocation7_spill] sm:$0xff] }
 0x14b   : > { %4660 = vst [vmem:[#allocation75_spill] sm:$0xff] %v3745_v38  ;;  %4661 = vst [vmem:[#allocation76_spill] sm:$0xff] %v3748_v1  ;;  %v3763_v38 = vmul.f32 %v3110_v54, %v1109_v13  ;;  %v1787_v21 = vsel %vm1209_vm8, %v1785_v60, %v1786_v36  ;;  %v4665_v13 = vld [vmem:[#allocation6_spill] sm:$0xff]  ;;  %v4668_v50 = vrot.slane %v4667_v53, 2  ;;  %vm2092_vm7 = vcmask 392192  }
 0x14c   : > { %4662 = vst [vmem:[#allocation77_spill] sm:$0xff] %v3751_v27  ;;  %4663 = vst [vmem:[#allocation78_spill] sm:$0xff] %v3760_v51  ;;  %v4666_v26 = vrot.slane %v4665_v13, 1  ;;  %v1912_v31 = vsel %vm1335_vm12, %v1910_v32, %v1911_v9  ;;  %v1841_v44 = vadd.f32 %v1787_v21, %v1716_v62  ;;  %v937_v34 = vmax.f32 %v907_v48, 0.0  ;;  %v3788_v18 = vld [vmem:[%s4476_s3] ss:$0 sm:$0xff] }
 0x14d   : > { %4664 = vst [vmem:[#allocation79_spill] sm:$0xff] %v3763_v38  ;;  %v1914_v6 = vsel %vm1335_vm12, %v1911_v9, %v4668_v50  ;;  %v914_v60 = vadd.f32 %v3788_v18, %v877_v35  ;;  %v871_v62 = vmul.f32 %v3771_v63, %v3255_v43  ;;  %v4672_v9 = vld [vmem:[#allocation3_spill] sm:$0xff]  ;;  %v3814_v50 = vld [vmem:[%s4479_s6] ss:$0 sm:$0xff] }
 0x14e   : > { %v1789_v57 = vsel %vm1209_vm8, %v1786_v36, %v4666_v26  ;;  %v3795_v36 = vld [vmem:[%s4478_s5] ss:$0 sm:$0xff]  ;;  %v879_v48 = vmul.f32 %v3771_v63, %v4672_v9  ;;  %v1966_v21 = vadd.f32 %v1912_v31, %v1841_v44 }
 0x14f   : > { %v1842_v24 = vadd.f32 %v1789_v57, %v1717_v52  ;;  %v4671_v52 = vld [vmem:[#allocation2_spill] sm:$0xff]  ;;  %v967_v57 = vmin.f32 %v937_v34, 6.0  ;;  %v944_v53 = vmax.f32 %v914_v60, 0.0  ;;  %v908_v13 = vadd.f32 %v3788_v18, %v871_v62 }
 0x150   : > { %v881_v35 = vmul.f32 %v3771_v63, %v4671_v52  ;;  %v916_v45 = vadd.f32 %v3788_v18, %v879_v48  ;;  %v3821_v52 = vmul.f32 %v2945_v59, %v3551_v49  ;;  %v2674_v60 = vld [vmem:[%s4477_s4 + $0x1] ss:$0 sm:$0xff] }
 0x151   : > { %v1967_v26 = vadd.f32 %v1914_v6, %v1842_v24  ;;  %v1989_v6 = vmul.f32 %v3795_v36, %v1966_v21  ;;  %v3827_v24 = vsel %vm3801_vm4, %v967_v57, 0.0  ;;  %v974_v44 = vmin.f32 %v944_v53, 6.0 }
 0x152   : > { %v918_v43 = vadd.f32 %v3788_v18, %v881_v35  ;;  %4673 = vst [vmem:[#allocation6_spill] sm:$0xff] %v3827_v24  ;;  %v3831_v31 = vmul.f32 %v2945_v59, %v3827_v24  ;;  %v3837_v62 = vmul.f32 %v2674_v60, %v3827_v24  ;;  %v2675_v35 = vld [vmem:[%s4477_s4 + $0x2] ss:$0 sm:$0xff]  ;;  %v1182_v9 = vmul.f32 %v2674_v60, %v3551_v49 }
 0x153   : > { %v1990_v34 = vmul.f32 %v3795_v36, %v1967_v26  ;;  %v3843_v32 = vmul.f32 %v2675_v35, %v3827_v24  ;;  %v2012_v48 = vadd.f32 %v3814_v50, %v1989_v6  ;;  %v3850_v21 = vmul.f32 %v3033_v12, %v3827_v24 }
 0x154   : > { %4674 = vst [vmem:[#allocation7_spill] sm:$0xff] %v3831_v31  ;;  %4675 = vst [vmem:[#allocation2_spill] sm:$0xff] %v3837_v62  ;;  %v3854_v26 = vmul.f32 %v3002_v55, %v3827_v24  ;;  %v3859_v53 = vmul.f32 %v3007_v58, %v3827_v24  ;;  %v3863_v31 = vsel %vm3608_vm11, %v974_v44, 0.0  ;;  %v938_v6 = vmax.f32 %v908_v13, 0.0 }
 0x155   : > { %4676 = vst [vmem:[#allocation3_spill] sm:$0xff] %v3843_v32  ;;  %v2013_v59 = vadd.f32 %v3814_v50, %v1990_v34  ;;  %4677 = vst [vmem:[#allocation80_spill] sm:$0xff] %v3850_v21  ;;  %v2028_v34 = vmax.f32 %v2012_v48, 0.0  ;;  %v3869_v38 = vmul.f32 %v3033_v12, %v3863_v31  ;;  %v1472_v57 = vmul.f32 %v3002_v55, %v3863_v31 }
 0x156   : > { %4678 = vst [vmem:[#allocation81_spill] sm:$0xff] %v3854_v26  ;;  %4679 = vst [vmem:[#allocation82_spill] sm:$0xff] %v3859_v53  ;;  %v3875_v62 = vmul.f32 %v3007_v58, %v3863_v31  ;;  %v3879_v47 = vmul.f32 %v3105_v40, %v3863_v31  ;;  %v968_v1 = vmin.f32 %v938_v6, 6.0  ;;  %v948_v26 = vmax.f32 %v918_v43, 0.0  ;;  %v2676_v43 = vld [vmem:[%s4477_s4] ss:$0 sm:$0xff] }
 0x157   : > { %4680 = vst [vmem:[#allocation83_spill] sm:$0xff] %v3863_v31  ;;  %v2029_v27 = vmax.f32 %v2013_v59, 0.0  ;;  %v2044_v44 = vmin.f32 %v2028_v34, 6.0  ;;  %v3891_v59 = vmul.f32 %v3110_v54, %v3863_v31  ;;  %v1534_v21 = vrot.slane %v1472_v57, 1 }
 0x158   : > { %4681 = vst [vmem:[#allocation84_spill] sm:$0xff] %v3879_v47  ;;  %v1659_v32 = vrot.slane %v3875_v62, 2  ;;  %v3898_v24 = vsel %vm3667_vm13, %v968_v1, 0.0  ;;  %v946_v57 = vmax.f32 %v916_v45, 0.0  ;;  %v978_v34 = vmin.f32 %v948_v26, 6.0 }
 0x159   : > { %v2045_v48 = vmin.f32 %v2029_v27, 6.0  ;;  %4684 = vst [vmem:[#allocation85_spill] sm:$0xff] %v3891_v59  ;;  %v1137_v62 = vmul.f32 %v2676_v43, %v3898_v24  ;;  %v3913_v6 = vmul.f32 %v2674_v60, %v3898_v24  ;;  %v3916_v1 = vmul.f32 %v2675_v35, %v3898_v24 }
 0x15a   : > { %v3920_v28 = vmul.f32 %v3033_v12, %v3898_v24  ;;  %v3929_v37 = vmul.f32 %v3002_v55, %v3898_v24  ;;  %v3933_v45 = vmul.f32 %v3007_v58, %v3898_v24  ;;  %v1183_v25 = vmul.f32 %v2674_v60, %v3646_v7 }
 0x15b   : > { %v2060_v51 = vpack.c.bf16 %v2045_v48, %v2044_v44  ;;  %v976_v44 = vmin.f32 %v946_v57, 6.0  ;;  %v4552_v12 = vrot.slane %v3913_v6, 1  ;;  %v1245_v11 = vrot.slane %v1182_v9, 1 }
 0x15c   : > { %v1308_v31 = vmul.f32 %v2675_v35, %v3551_v49  ;;  %v4687_v58 = vrot.slane %v3738_v42, 1  ;;  %v1246_v9 = vrot.slane %v1183_v25, 1  ;;  %v1309_v27 = vmul.f32 %v2675_v35, %v3646_v7 }
 0x15d   : > { %2588 = vmatprep.mubr.msk.bf16.mxu1 %vm2092_vm7, %v2060_v51  ;;  %v1118_v51 = vsel %vm3904_vm10, %v978_v34, 0.0  ;;  %v1116_v55 = vsel %vm1053_vm5, %v976_v44, 0.0  ;;  %v4689_v44 = vrot.slane %v3724_v39, 1  ;;  %v4690_v59 = vrot.slane %v3727_v20, 2 }
 0x15e   : > { %v1244_v26 = vsel %vm1209_vm8, %v4552_v12, %v4687_v58  ;;  %v3948_v57 = vmul.f32 %v3105_v40, %v1118_v51  ;;  %v3951_v60 = vmul.f32 %v3110_v54, %v1118_v51  ;;  %v1371_v34 = vrot.slane %v1308_v31, 2 }
 0x15f   : > { %v3953_v48 = vadd.f32 %v1244_v26, %v1137_v62  ;;  %v1535_v42 = vsel %vm1209_vm8, %v4689_v44, %v1534_v21  ;;  %v1247_v12 = vsel %vm1209_vm8, %v1245_v11, %v1246_v9  ;;  %v1660_v51 = vsel %vm1335_vm12, %v4690_v59, %v1659_v32  ;;  %v4691_v26 = vld [vmem:[#allocation4_spill] sm:$0xff] }
 0x160   : > { %v1823_v53 = vrot.slane %v3948_v57, 1  ;;  %v1280_v62 = vadd.f32 %v1247_v12, %v3821_v52  ;;  %v1372_v25 = vrot.slane %v1309_v27, 2  ;;  %v1714_v35 = vmul.f32 %v3273_v14, %v1116_v55 }
 0x161   : > { %4688 = vst [vmem:[#allocation86_spill] sm:$0xff] %v3953_v48  ;;  %v1758_v31 = vmul.f32 %v3105_v40, %v1116_v55  ;;  %v1883_v39 = vmul.f32 %v3110_v54, %v1116_v55  ;;  %v880_v57 = vmul.f32 %v3771_v63, %v4691_v26  ;;  %v1139_v44 = vmul.f32 %v2676_v43, %v3646_v7 }
 0x162   : > { %v4692_v11 = vrot.slane %v3491_v8, 1  ;;  %v1373_v59 = vsel %vm1335_vm12, %v1371_v34, %v1372_v25  ;;  %v4693_v52 = vrot.slane %v3521_v33, 2  ;;  %v4694_v27 = vrot.slane %v3678_v16, 1 }
 0x163   : > { %v1820_v58 = vrot.slane %v1758_v31, 1  ;;  %v1406_v47 = vadd.f32 %v1373_v59, %v1280_v62  ;;  %v1945_v48 = vrot.slane %v1883_v39, 2  ;;  %v917_v63 = vadd.f32 %v3788_v18, %v880_v57  ;;  %v4706_v59 = vld [vmem:[#allocation8_spill] sm:$0xff] }
 0x164   : > { %v1249_v20 = vsel %vm1209_vm8, %v1246_v9, %v4692_v11  ;;  %v1375_v12 = vsel %vm1335_vm12, %v1372_v25, %v4693_v52  ;;  %v1537_v55 = vsel %vm1209_vm8, %v1534_v21, %v4694_v27  ;;  %v4695_v8 = vrot.slane %v3681_v56, 2  ;;  %v4704_v11 = vld [vmem:[#allocation11_spill] sm:$0xff]  ;;  %v4708_v27 = vld [vmem:[#allocation12_spill] sm:$0xff] }
 0x165   : > { %v1281_v43 = vadd.f32 %v1249_v20, %v1139_v44  ;;  %v4696_v34 = vrot.slane %v3335_v41, 1  ;;  %v4697_v31 = vrot.slane %v3287_v17, 1  ;;  %v4698_v25 = vrot.slane %v3246_v5, 1 }
 0x166   : > { %v1662_v9 = vsel %vm1335_vm12, %v1659_v32, %v4695_v8  ;;  %v4700_v62 = vrot.slane %v3350_v30, 2  ;;  %v4701_v18 = vrot.slane %v3290_v10, 2  ;;  %v1443_v32 = vadd.f32 %v3721_v61, %v1406_v47  ;;  %v4710_v47 = vld [vmem:[#allocation9_spill] sm:$0xff]  ;;  %v4712_v8 = vld [vmem:[#allocation10_spill] sm:$0xff] }
 0x167   : > { %v1792_v33 = vsel %vm1209_vm8, %v4697_v31, %v4696_v34  ;;  %v4699_v16 = vmov %v4696_v34  ;;  %v947_v39 = vmax.f32 %v917_v63, 0.0  ;;  %v1407_v26 = vadd.f32 %v1375_v12, %v1281_v43  ;;  %v4713_v31 = vld [vmem:[#allocation5_spill] sm:$0xff] }
 0x168   : > { %v1794_v21 = vsel %vm1209_vm8, %v4699_v16, %v4698_v25  ;;  %v1917_v56 = vsel %vm1335_vm12, %v4701_v18, %v4700_v62  ;;  %v1843_v17 = vadd.f32 %v1792_v33, %v3293_v2  ;;  %v4702_v5 = vrot.slane %v3249_v19, 2  ;;  %v4718_v18 = vld [vmem:[#allocation21_spill] sm:$0xff] }
 0x169   : > { %v1844_v57 = vadd.f32 %v1794_v21, %v3347_v3  ;;  %v4703_v41 = vmov %v4700_v62  ;;  %v4705_v20 = vrot.slane %v4704_v11, 1  ;;  %v4707_v10 = vrot.slane %v4706_v59, 1  ;;  %v4716_v21 = vld [vmem:[#allocation26_spill] sm:$0xff] }
 0x16a   : > { %v1919_v44 = vsel %vm1335_vm12, %v4703_v41, %v4702_v5  ;;  %v4709_v61 = vrot.slane %v4708_v27, 2  ;;  %v4711_v12 = vrot.slane %v4710_v47, 2  ;;  %v1568_v63 = vadd.f32 %v1535_v42, %v1443_v32  ;;  %v4721_v47 = vld [vmem:[#allocation20_spill] sm:$0xff] }
 0x16b   : > { %v1222_v52 = vsel %vm1209_vm8, %v4707_v10, %v4705_v20  ;;  %v977_v3 = vmin.f32 %v947_v39, 6.0  ;;  %v1444_v19 = vadd.f32 %v3869_v38, %v1407_v26  ;;  %v1968_v43 = vadd.f32 %v1917_v56, %v1843_v17 }
 0x16c   : > { %v1348_v2 = vsel %vm1335_vm12, %v4711_v12, %v4709_v61  ;;  %v1969_v30 = vadd.f32 %v1919_v44, %v1844_v57  ;;  %v1270_v34 = vadd.f32 %v1222_v52, %v4712_v8  ;;  %v4714_v33 = vrot.slane %v4713_v31, 2 }
 0x16d   : > { %v4715_v25 = vmov %v4709_v61  ;;  %v4717_v62 = vrot.slane %v4716_v21, 1  ;;  %v4719_v5 = vrot.slane %v4718_v18, 1  ;;  %v1693_v42 = vadd.f32 %v1660_v51, %v1568_v63  ;;  %v4722_v63 = vld [vmem:[#allocation15_spill] sm:$0xff]  ;;  %v4727_v21 = vld [vmem:[#allocation22_spill] sm:$0xff] }
 0x16e   : > { %v1350_v16 = vsel %vm1335_vm12, %v4715_v25, %v4714_v33  ;;  %v1117_v38 = vsel %vm3885_vm9, %v977_v3, 0.0  ;;  %v1569_v56 = vadd.f32 %v1537_v55, %v1444_v19  ;;  %v1991_v32 = vmul.f32 %v3795_v36, %v1968_v43  ;;  %v4720_v55 = vld [vmem:[#allocation13_spill] sm:$0xff] }
 0x16f   : > { %v1510_v41 = vsel %vm1209_vm8, %v4719_v5, %v4717_v62  ;;  %v1715_v39 = vmul.f32 %v3273_v14, %v1117_v38  ;;  %v1759_v26 = vmul.f32 %v3105_v40, %v1117_v38  ;;  %v1884_v17 = vmul.f32 %v3110_v54, %v1117_v38 }
 0x170   : > { %v1992_v57 = vmul.f32 %v3795_v36, %v1969_v30  ;;  %v1730_v44 = vadd.f32 %v1714_v35, %v1693_v42  ;;  %v1694_v11 = vadd.f32 %v1662_v9, %v1569_v56  ;;  %v2014_v20 = vadd.f32 %v3814_v50, %v1991_v32  ;;  %v4728_v42 = vld [vmem:[#allocation27_spill] sm:$0xff]  ;;  %v4729_v56 = vld [vmem:[#allocation34_spill] sm:$0xff] }
 0x171   : > { %v1396_v59 = vadd.f32 %v1348_v2, %v1270_v34  ;;  %v1821_v51 = vrot.slane %v1759_v26, 1  ;;  %v1946_v10 = vrot.slane %v1884_v17, 2  ;;  %v1397_v52 = vadd.f32 %v1350_v16, %v4720_v55  ;;  %v4726_v16 = vld [vmem:[#allocation25_spill] sm:$0xff]  ;;  %v4730_v26 = vld [vmem:[#allocation16_spill] sm:$0xff]  ;;  %v4077_v55 = vld [vmem:[%s4477_s4 + $0x8] ss:$0 sm:$0xff] }
 0x172   : > { %v2015_v13 = vadd.f32 %v3814_v50, %v1992_v57  ;;  %v1731_v27 = vadd.f32 %v1715_v39, %v1694_v11  ;;  %v2030_v61 = vmax.f32 %v2014_v20, 0.0  ;;  %v4723_v3 = vrot.slane %v4722_v63, 1 }
 0x173   : > { %v1433_v12 = vadd.f32 %v4721_v47, %v1396_v59  ;;  %v4724_v19 = vmov %v4717_v62  ;;  %v1822_v9 = vsel %vm1209_vm8, %v1820_v58, %v1821_v51  ;;  %v1824_v2 = vsel %vm1209_vm8, %v1821_v51, %v1823_v53  ;;  %v4735_v47 = vld [vmem:[#allocation18_spill] sm:$0xff] }
 0x174   : > { %v1512_v35 = vsel %vm1209_vm8, %v4724_v19, %v4723_v3  ;;  %v1947_v43 = vsel %vm1335_vm12, %v1945_v48, %v1946_v10  ;;  %v4725_v30 = vrot.slane %v3951_v60, 2  ;;  %v1855_v34 = vadd.f32 %v1822_v9, %v1730_v44 }
 0x175   : > { %v1856_v31 = vadd.f32 %v1824_v2, %v1731_v27  ;;  %v2031_v33 = vmax.f32 %v2015_v13, 0.0  ;;  %v2046_v25 = vmin.f32 %v2030_v61, 6.0  ;;  %v1434_v62 = vadd.f32 %v4726_v16, %v1397_v52  ;;  %v4733_v27 = vld [vmem:[#allocation23_spill] sm:$0xff]  ;;  %v4742_v16 = vld [vmem:[#allocation32_spill] sm:$0xff] }
 0x176   : > { %v1949_v8 = vsel %vm1335_vm12, %v1946_v10, %v4725_v30  ;;  %v1558_v18 = vadd.f32 %v1510_v41, %v1433_v12  ;;  %v1633_v5 = vrot.slane %v4727_v21, 2  ;;  %v1634_v38 = vrot.slane %v4728_v42, 2  ;;  %v4732_v41 = vld [vmem:[#allocation41_spill] sm:$0xff]  ;;  %v4738_v30 = vld [vmem:[#allocation24_spill] sm:$0xff]  ;;  %v4744_v21 = vld [vmem:[#allocation14_spill] sm:$0xff] }
 0x177   : > { %v4056_v58 = vadd.f32 %v1947_v43, %v1855_v34  ;;  %v4058_v53 = vadd.f32 %v1949_v8, %v1856_v31  ;;  %v2047_v48 = vmin.f32 %v2031_v33, 6.0  ;;  %v1704_v60 = vmul.f32 %v3273_v14, %v4729_v56  ;;  %v4740_v34 = vld [vmem:[#allocation19_spill] sm:$0xff] }
 0x178   : > { %v1559_v32 = vadd.f32 %v1512_v35, %v1434_v62  ;;  %v1635_v39 = vsel %vm1335_vm12, %v1633_v5, %v1634_v38  ;;  %v4731_v17 = vrot.slane %v4730_v26, 2  ;;  %v1705_v44 = vmul.f32 %v3273_v14, %v4732_v41 }
 0x179   : > { %v2061_v11 = vpack.c.bf16 %v2047_v48, %v2046_v25  ;;  %v1683_v20 = vadd.f32 %v1635_v39, %v1558_v18  ;;  %v1743_v59 = vmul.f32 %v3105_v40, %v4729_v56  ;;  %v1744_v51 = vmul.f32 %v3105_v40, %v4732_v41  ;;  %v4747_v39 = vld [vmem:[#allocation33_spill] sm:$0xff] }
 0x17a   : > { %v1637_v57 = vsel %vm1335_vm12, %v1634_v38, %v4731_v17  ;;  %v1868_v13 = vmul.f32 %v3110_v54, %v4729_v56  ;;  %v1869_v52 = vmul.f32 %v4077_v55, %v4732_v41  ;;  %v4734_v61 = vrot.slane %v4733_v27, 1  ;;  %v4737_v54 = vld [vmem:[#allocation17_spill] sm:$0xff] }
 0x17b   : > { %v1684_v10 = vadd.f32 %v1637_v57, %v1559_v32  ;;  %v4736_v12 = vrot.slane %v4735_v47, 1  ;;  %2589 = vmatmul.mubr.msk.bf16.vlgmr.msra.gmra.mrb[12].mxu1 %vm2092_vm7, %v2061_v11  ;;  %v1720_v40 = vadd.f32 %v1704_v60, %v1683_v20  ;;  %v1795_v3 = vrot.slane %v1743_v59, 1  ;;  %v4749_v57 = vld [vmem:[#allocation28_spill] sm:$0xff]  ;;  %v4752_v59 = vld [vmem:[#allocation39_spill] sm:$0xff] }
 0x17c   : > { %v1796_v19 = vrot.slane %v1744_v51, 1  ;;  %v1920_v2 = vrot.slane %v1868_v13, 2  ;;  %v1921_v43 = vrot.slane %v1869_v52, 2  ;;  %v4739_v8 = vrot.slane %v4738_v30, 2  ;;  %v4754_v13 = vld [vmem:[#allocation30_spill] sm:$0xff] }
 0x17d   : > { %v1227_v63 = vsel %vm1209_vm8, %v4736_v12, %v4734_v61  ;;  %v1721_v9 = vadd.f32 %v1705_v44, %v1684_v10  ;;  %v4741_v31 = vrot.slane %v4740_v34, 2  ;;  %v4743_v62 = vrot.slane %v4742_v16, 1  ;;  %v4750_v44 = vld [vmem:[#allocation38_spill] sm:$0xff]  ;;  %v4760_v34 = vld [vmem:[#allocation31_spill] sm:$0xff] }
 0x17e   : > { %v1272_v35 = vadd.f32 %v1227_v63, %v4737_v54  ;;  %v1797_v25 = vsel %vm1209_vm8, %v1795_v3, %v1796_v19  ;;  %v4745_v5 = vrot.slane %v4744_v21, 2  ;;  %v4746_v42 = vmov %v4739_v8  ;;  %v4757_v63 = vld [vmem:[#allocation40_spill] sm:$0xff]  ;;  %v4758_v3 = vld [vmem:[#allocation45_spill] sm:$0xff] }
 0x17f   : > { %v1353_v33 = vsel %vm1335_vm12, %v4741_v31, %v4739_v8  ;;  %v1799_v18 = vsel %vm1209_vm8, %v1796_v19, %v4743_v62  ;;  %v1845_v56 = vadd.f32 %v1797_v25, %v1720_v40  ;;  %v1922_v32 = vsel %vm1335_vm12, %v1920_v2, %v1921_v43  ;;  %v4759_v54 = vld [vmem:[#allocation44_spill] sm:$0xff]  ;;  %v4134_v62 = vld [vmem:[%s4477_s4 + $0x7] ss:$0 sm:$0xff] }
 0x180   : > { %v1355_v38 = vsel %vm1335_vm12, %v4746_v42, %v4745_v5  ;;  %v1398_v48 = vadd.f32 %v1353_v33, %v1272_v35  ;;  %v1846_v60 = vadd.f32 %v1799_v18, %v1721_v9  ;;  %v4748_v26 = vrot.slane %v4747_v39, 2 }
 0x181   : > { %v1399_v41 = vadd.f32 %v1355_v38, %v4749_v57  ;;  %v4751_v20 = vrot.slane %v3477_v0, 1  ;;  %v4753_v51 = vrot.slane %v4752_v59, 1  ;;  %v4755_v52 = vrot.slane %v4754_v13, 1 }
 0x182   : > { %v1924_v17 = vsel %vm1335_vm12, %v1921_v43, %v4748_v26  ;;  %v1435_v11 = vadd.f32 %v4750_v44, %v1398_v48  ;;  %v1970_v47 = vadd.f32 %v1922_v32, %v1845_v56  ;;  %v1638_v40 = vrot.slane %v4757_v63, 2 }
 0x183   : > { %v1515_v10 = vsel %vm1209_vm8, %v4753_v51, %v4751_v20  ;;  %v4756_v27 = vmov %v4751_v20  ;;  %v1971_v12 = vadd.f32 %v1924_v17, %v1846_v60  ;;  %v1639_v19 = vrot.slane %v4758_v3, 2  ;;  %v4763_v51 = vld [vmem:[#allocation42_spill] sm:$0xff]  ;;  %v4768_v3 = vld [vmem:[#allocation35_spill] sm:$0xff] }
 0x184   : > { %v1517_v61 = vsel %vm1209_vm8, %v4756_v27, %v4755_v52  ;;  %v1436_v35 = vadd.f32 %v4759_v54, %v1399_v41  ;;  %v1560_v9 = vadd.f32 %v1515_v10, %v1435_v11  ;;  %v1706_v2 = vmul.f32 %v3273_v14, %v3554_v4  ;;  %v4765_v10 = vld [vmem:[#allocation36_spill] sm:$0xff] }
 0x185   : > { %v1707_v43 = vmul.f32 %v3273_v14, %v3595_v15  ;;  %v1993_v30 = vmul.f32 %v3795_v36, %v1970_v47  ;;  %v1994_v0 = vmul.f32 %v3795_v36, %v1971_v12  ;;  %v1640_v8 = vsel %vm1335_vm12, %v1638_v40, %v1639_v19 }
 0x186   : > { %v4761_v31 = vrot.slane %v4760_v34, 2  ;;  %v1561_v25 = vadd.f32 %v1517_v61, %v1436_v35  ;;  %v1685_v16 = vadd.f32 %v1640_v8, %v1560_v9  ;;  %v1746_v18 = vmul.f32 %v4134_v62, %v3554_v4  ;;  %v4771_v35 = vld [vmem:[#allocation37_spill] sm:$0xff] }
 0x187   : > { %v1747_v21 = vmul.f32 %v4134_v62, %v3595_v15  ;;  %v2016_v5 = vadd.f32 %v3814_v50, %v1993_v30  ;;  %v2017_v42 = vadd.f32 %v3814_v50, %v1994_v0  ;;  %v1871_v38 = vmul.f32 %v4077_v55, %v3554_v4  ;;  %v4773_v0 = vld [vmem:[#allocation29_spill] sm:$0xff] }
 0x188   : > { %v1642_v33 = vsel %vm1335_vm12, %v1639_v19, %v4761_v31  ;;  %v1872_v48 = vmul.f32 %v4077_v55, %v3595_v15  ;;  %v1722_v60 = vadd.f32 %v1706_v2, %v1685_v16  ;;  %v1800_v32 = vrot.slane %v1746_v18, 1  ;;  %v4769_v19 = vld [vmem:[#allocation43_spill] sm:$0xff] }
 0x189   : > { %v1686_v56 = vadd.f32 %v1642_v33, %v1561_v25  ;;  %v1801_v39 = vrot.slane %v1747_v21, 1  ;;  %v2032_v26 = vmax.f32 %v2016_v5, 0.0  ;;  %v2033_v17 = vmax.f32 %v2017_v42, 0.0  ;;  %v4778_v21 = vld [vmem:[#allocation49_spill] sm:$0xff]  ;;  %v4779_v42 = vld [vmem:[#allocation47_spill] sm:$0xff] }
 0x18a   : > { %v1925_v57 = vrot.slane %v1871_v38, 2  ;;  %v1926_v41 = vrot.slane %v1872_v48, 2  ;;  %v4762_v20 = vrot.slane %v3501_v29, 1  ;;  %v4764_v4 = vrot.slane %v4763_v51, 1 }
 0x18b   : > { %v1723_v44 = vadd.f32 %v1707_v43, %v1686_v56  ;;  %v1802_v11 = vsel %vm1209_vm8, %v1800_v32, %v1801_v39  ;;  %v4766_v13 = vrot.slane %v4765_v10, 1  ;;  %v2048_v52 = vmin.f32 %v2032_v26, 6.0  ;;  %v4782_v32 = vld [vmem:[#allocation61_spill] sm:$0xff]  ;;  %v4787_v10 = vld [vmem:[#allocation48_spill] sm:$0xff] }
 0x18c   : > { %v1804_v59 = vsel %vm1209_vm8, %v1801_v39, %v4762_v20  ;;  %v2049_v27 = vmin.f32 %v2033_v17, 6.0  ;;  %v1847_v61 = vadd.f32 %v1802_v11, %v1722_v60  ;;  %v1927_v47 = vsel %vm1335_vm12, %v1925_v57, %v1926_v41  ;;  %v4783_v26 = vld [vmem:[#allocation65_spill] sm:$0xff]  ;;  %v4784_v17 = vld [vmem:[#allocation6_spill] sm:$0xff]  ;;  %v4786_v20 = vld [vmem:[#allocation64_spill] sm:$0xff] }
 0x18d   : > { %v1232_v15 = vsel %vm1209_vm8, %v4766_v13, %v4764_v4  ;;  %v1848_v12 = vadd.f32 %v1804_v59, %v1723_v44  ;;  %v4767_v63 = vrot.slane %v3511_v46, 2  ;;  %v4770_v54 = vrot.slane %v4769_v19, 2  ;;  %v4785_v44 = vld [vmem:[#allocation60_spill] sm:$0xff] }
 0x18e   : > { %v1274_v29 = vadd.f32 %v1232_v15, %v4768_v3  ;;  %v4772_v9 = vrot.slane %v4771_v35, 2  ;;  %v2062_v43 = vpack.c.bf16 %v2049_v27, %v2048_v52  ;;  %v1972_v30 = vadd.f32 %v1927_v47, %v1847_v61 }
 0x18f   : > { %v1929_v40 = vsel %vm1335_vm12, %v1926_v41, %v4767_v63  ;;  %v4774_v8 = vrot.slane %v4773_v0, 2  ;;  %v4775_v34 = vmov %v4770_v54  ;;  %v4776_v46 = vrot.slane %v3621_v23, 1 }
 0x190   : > { %v1358_v2 = vsel %vm1335_vm12, %v4772_v9, %v4770_v54  ;;  %v4777_v33 = vrot.slane %v3587_v22, 1  ;;  %v1973_v16 = vadd.f32 %v1929_v40, %v1848_v12  ;;  %v4780_v38 = vrot.slane %v4779_v42, 1  ;;  %2592 = vmatprep.mubr.msk.bf16.mxu1 %vm2092_vm7, %v2062_v43  ;;  %v4795_v42 = vld [vmem:[#allocation79_spill] sm:$0xff] }
 0x191   : > { %v1360_v31 = vsel %vm1335_vm12, %v4775_v34, %v4774_v8  ;;  %v1400_v18 = vadd.f32 %v1358_v2, %v1274_v29  ;;  %v4781_v48 = vmov %v4776_v46  ;;  %v1995_v60 = vmul.f32 %v3795_v36, %v1972_v30  ;;  %v4789_v30 = vld [vmem:[#allocation62_spill] sm:$0xff]  ;;  %v4791_v8 = vld [vmem:[#allocation57_spill] sm:$0xff] }
 0x192   : > { %v1520_v25 = vsel %vm1209_vm8, %v4777_v33, %v4776_v46  ;;  %v1401_v5 = vadd.f32 %v1360_v31, %v4778_v21  ;;  %v1522_v56 = vsel %vm1209_vm8, %v4781_v48, %v4780_v38  ;;  %v1643_v39 = vrot.slane %v4782_v32, 2 }
 0x193   : > { %v1644_v22 = vrot.slane %v4783_v26, 2  ;;  %v1708_v57 = vmul.f32 %v3273_v14, %v4784_v17  ;;  %v1996_v41 = vmul.f32 %v3795_v36, %v1973_v16  ;;  %v1437_v11 = vadd.f32 %v4785_v44, %v1400_v18  ;;  %v4793_v18 = vld [vmem:[#allocation78_spill] sm:$0xff] }
 0x194   : > { %v1438_v59 = vadd.f32 %v4786_v20, %v1401_v5  ;;  %v1709_v23 = vmul.f32 %v3273_v14, %v3898_v24  ;;  %v2018_v51 = vadd.f32 %v3814_v50, %v1995_v60  ;;  %v4788_v13 = vrot.slane %v4787_v10, 2  ;;  %v4806_v10 = vld [vmem:[#allocation81_spill] sm:$0xff] }
 0x195   : > { %v1645_v4 = vsel %vm1335_vm12, %v1643_v39, %v1644_v22  ;;  %v1749_v52 = vmul.f32 %v4134_v62, %v4784_v17  ;;  %v2019_v27 = vadd.f32 %v3814_v50, %v1996_v41  ;;  %v1562_v61 = vadd.f32 %v1520_v25, %v1437_v11  ;;  %v4802_v11 = vld [vmem:[#allocation46_spill] sm:$0xff] }
 0x196   : > { %v1647_v15 = vsel %vm1335_vm12, %v1644_v22, %v4788_v13  ;;  %v1563_v47 = vadd.f32 %v1522_v56, %v1438_v59  ;;  %v1750_v12 = vmul.f32 %v4134_v62, %v3898_v24  ;;  %v2034_v63 = vmax.f32 %v2018_v51, 0.0  ;;  %v4797_v56 = vld [vmem:[#allocation56_spill] sm:$0xff]  ;;  %v4798_v22 = vld [vmem:[#allocation63_spill] sm:$0xff] }
 0x197   : > { %v1805_v14 = vrot.slane %v1749_v52, 1  ;;  %v1874_v40 = vmul.f32 %v4077_v55, %v4784_v17  ;;  %v1875_v3 = vmul.f32 %v4077_v55, %v3898_v24  ;;  %v2035_v29 = vmax.f32 %v2019_v27, 0.0  ;;  %v4808_v52 = vld [vmem:[#allocation76_spill] sm:$0xff] }
 0x198   : > { %v1687_v19 = vadd.f32 %v1645_v4, %v1562_v61  ;;  %v1688_v54 = vadd.f32 %v1647_v15, %v1563_v47  ;;  %v1806_v35 = vrot.slane %v1750_v12, 1  ;;  %v2050_v9 = vmin.f32 %v2034_v63, 6.0 }
 0x199   : > { %v1930_v2 = vrot.slane %v1874_v40, 2  ;;  %v1931_v43 = vrot.slane %v1875_v3, 2  ;;  %v4790_v0 = vrot.slane %v4789_v30, 1  ;;  %v4792_v34 = vrot.slane %v4791_v8, 1  ;;  %v4812_v3 = vld [vmem:[#allocation82_spill] sm:$0xff] }
 0x19a   : > { %v2051_v46 = vmin.f32 %v2035_v29, 6.0  ;;  %v1724_v33 = vadd.f32 %v1708_v57, %v1687_v19  ;;  %v1725_v25 = vadd.f32 %v1709_v23, %v1688_v54  ;;  %v1807_v16 = vsel %vm1209_vm8, %v1805_v14, %v1806_v35  ;;  %v4800_v57 = vld [vmem:[#allocation58_spill] sm:$0xff]  ;;  %v4813_v19 = vld [vmem:[#allocation80_spill] sm:$0xff] }
 0x19b   : > { %v1237_v31 = vsel %vm1209_vm8, %v4792_v34, %v4790_v0  ;;  %v4794_v24 = vrot.slane %v4793_v18, 1  ;;  %v1932_v5 = vsel %vm1335_vm12, %v1930_v2, %v1931_v43  ;;  %v4796_v38 = vrot.slane %v4795_v42, 2  ;;  %v4811_v14 = vld [vmem:[#allocation66_spill] sm:$0xff] }
 0x19c   : > { %v1276_v60 = vadd.f32 %v1237_v31, %v4797_v56  ;;  %v2063_v32 = vpack.c.bf16 %v2051_v46, %v2050_v9  ;;  %v1849_v39 = vadd.f32 %v1807_v16, %v1724_v33  ;;  %v4799_v17 = vrot.slane %v4798_v22, 2  ;;  %v4248_v9 = vld [vmem:[%s4477_s4 + $0x6] ss:$0 sm:$0xff]  ;;  %v4814_v31 = vld [vmem:[#allocation77_spill] sm:$0xff] }
 0x19d   : > { %v1809_v21 = vsel %vm1209_vm8, %v1806_v35, %v4794_v24  ;;  %v1934_v48 = vsel %vm1335_vm12, %v1931_v43, %v4796_v38  ;;  %v4801_v41 = vrot.slane %v4800_v57, 2  ;;  %v4803_v20 = vrot.slane %v4802_v11, 2  ;;  %v4819_v57 = vld [vmem:[#allocation52_spill] sm:$0xff] }
 0x19e   : > { %v1850_v26 = vadd.f32 %v1809_v21, %v1725_v25  ;;  %v4804_v59 = vmov %v4799_v17  ;;  %v4805_v4 = vrot.slane %v3929_v37, 1  ;;  %v4807_v13 = vrot.slane %v4806_v10, 1  ;;  %2593 = vmatmul.mubr.msk.bf16.gmra.mrb[16].mxu1 %vm2092_vm7, %v2063_v32 }
 0x19f   : > { %v1363_v44 = vsel %vm1335_vm12, %v4801_v41, %v4799_v17  ;;  %v1365_v23 = vsel %vm1335_vm12, %v4804_v59, %v4803_v20  ;;  %v4809_v27 = vrot.slane %v4808_v52, 1  ;;  %v1974_v12 = vadd.f32 %v1932_v5, %v1849_v39 }
 0x1a0   : > { %v1402_v51 = vadd.f32 %v1363_v44, %v1276_v60  ;;  %v1525_v15 = vsel %vm1209_vm8, %v4807_v13, %v4805_v4  ;;  %v4810_v61 = vmov %v4805_v4  ;;  %v1975_v63 = vadd.f32 %v1934_v48, %v1850_v26  ;;  %v4823_v4 = vld [vmem:[#allocation3_spill] sm:$0xff] }
 0x1a1   : > { %v1527_v47 = vsel %vm1209_vm8, %v4810_v61, %v4809_v27  ;;  %v1403_v40 = vadd.f32 %v1365_v23, %v4811_v14  ;;  %v1648_v29 = vrot.slane %v4812_v3, 2  ;;  %v1649_v35 = vrot.slane %v3933_v45, 2  ;;  %v4821_v23 = vld [vmem:[#allocation7_spill] sm:$0xff]  ;;  %v4828_v14 = vld [vmem:[#allocation53_spill] sm:$0xff] }
 0x1a2   : > { %v1439_v54 = vadd.f32 %v4813_v19, %v1402_v51  ;;  %v1710_v37 = vmul.f32 %v4248_v9, %v3551_v49  ;;  %v1711_v2 = vmul.f32 %v4248_v9, %v3646_v7  ;;  %v1997_v43 = vmul.f32 %v3795_v36, %v1974_v12 }
 0x1a3   : > { %v1998_v30 = vmul.f32 %v3795_v36, %v1975_v63  ;;  %v1440_v0 = vadd.f32 %v3920_v28, %v1403_v40  ;;  %v1752_v45 = vmul.f32 %v4134_v62, %v3551_v49  ;;  %v1650_v34 = vsel %vm1335_vm12, %v1648_v29, %v1649_v35 }
 0x1a4   : > { %v1564_v8 = vadd.f32 %v1525_v15, %v1439_v54  ;;  %v4815_v46 = vrot.slane %v4814_v31, 2  ;;  %v1753_v25 = vmul.f32 %v4134_v62, %v3646_v7  ;;  %v2020_v16 = vadd.f32 %v3814_v50, %v1997_v43  ;;  %v4817_v62 = vld [vmem:[#allocation2_spill] sm:$0xff]  ;;  %v4833_v43 = vld [vmem:[#allocation55_spill] sm:$0xff] }
 0x1a5   : > { %v2021_v18 = vadd.f32 %v3814_v50, %v1998_v30  ;;  %v1565_v24 = vadd.f32 %v1527_v47, %v1440_v0  ;;  %v1810_v21 = vrot.slane %v1752_v45, 1  ;;  %v1877_v42 = vmul.f32 %v4077_v55, %v3551_v49  ;;  %v4825_v15 = vld [vmem:[#allocation74_spill] sm:$0xff] }
 0x1a6   : > { %v1652_v33 = vsel %vm1335_vm12, %v1649_v35, %v4815_v46  ;;  %v1689_v28 = vadd.f32 %v1650_v34, %v1564_v8  ;;  %v1811_v5 = vrot.slane %v1753_v25, 1  ;;  %v1878_v38 = vmul.f32 %v4077_v55, %v3646_v7  ;;  %v4830_v54 = vld [vmem:[#allocation86_spill] sm:$0xff]  ;;  %v4838_v46 = vld [vmem:[#allocation59_spill] sm:$0xff]  ;;  %v4839_v25 = vld [vmem:[#allocation69_spill] sm:$0xff] }
 0x1a7   : > { %v2036_v48 = vmax.f32 %v2020_v16, 0.0  ;;  %v2037_v56 = vmax.f32 %v2021_v18, 0.0  ;;  %v1690_v60 = vadd.f32 %v1652_v33, %v1565_v24  ;;  %v4816_v32 = vrot.slane %v3913_v6, 1  ;;  %v4835_v45 = vld [vmem:[#allocation50_spill] sm:$0xff] }
 0x1a8   : > { %v4818_v39 = vrot.slane %v4817_v62, 1  ;;  %v1726_v22 = vadd.f32 %v1710_v37, %v1689_v28  ;;  %v1812_v17 = vsel %vm1209_vm8, %v1810_v21, %v1811_v5  ;;  %v4820_v41 = vrot.slane %v4819_v57, 1  ;;  %v4831_v37 = vld [vmem:[#allocation68_spill] sm:$0xff]  ;;  %v4840_v24 = vld [vmem:[#allocation54_spill] sm:$0xff]  ;;  %v4841_v28 = vld [vmem:[#allocation67_spill] sm:$0xff] }
 0x1a9   : > { %v1935_v49 = vrot.slane %v1877_v42, 2  ;;  %v2052_v11 = vmin.f32 %v2036_v48, 6.0  ;;  %v2053_v20 = vmin.f32 %v2037_v56, 6.0  ;;  %v1727_v7 = vadd.f32 %v1711_v2, %v1690_v60  ;;  %v4842_v42 = vld [vmem:[#allocation84_spill] sm:$0xff] }
 0x1aa   : > { %v1242_v26 = vsel %vm1209_vm8, %v4818_v39, %v4816_v32  ;;  %v1814_v44 = vsel %vm1209_vm8, %v1811_v5, %v4820_v41  ;;  %v1936_v55 = vrot.slane %v1878_v38, 2  ;;  %v1851_v59 = vadd.f32 %v1812_v17, %v1726_v22  ;;  %v4844_v48 = vld [vmem:[#allocation72_spill] sm:$0xff]  ;;  %v4846_v39 = vld [vmem:[#allocation51_spill] sm:$0xff]  ;;  %v4848_v17 = vld [vmem:[#allocation70_spill] sm:$0xff] }
 0x1ab   : > { %v1278_v51 = vadd.f32 %v1242_v26, %v4821_v23  ;;  %v4822_v6 = vrot.slane %v3916_v1, 2  ;;  %v4824_v10 = vrot.slane %v4823_v4, 2  ;;  %v4826_v52 = vrot.slane %v4825_v15, 2  ;;  %v4855_v4 = vld [vmem:[#allocation71_spill] sm:$0xff] }
 0x1ac   : > { %v2064_v47 = vpack.c.bf16 %v2053_v20, %v2052_v11  ;;  %v1852_v12 = vadd.f32 %v1814_v44, %v1727_v7  ;;  %v1937_v63 = vsel %vm1335_vm12, %v1935_v49, %v1936_v55  ;;  %v4829_v40 = vrot.slane %v4828_v14, 2  ;;  %v4851_v7 = vld [vmem:[#allocation85_spill] sm:$0xff] }
 0x1ad   : > { %v1368_v13 = vsel %vm1335_vm12, %v4824_v10, %v4822_v6  ;;  %v4827_v27 = vmov %v4822_v6  ;;  %v1976_v29 = vadd.f32 %v1937_v63, %v1851_v59  ;;  %v4832_v2 = vrot.slane %v4831_v37, 1  ;;  %v4853_v59 = vld [vmem:[#allocation73_spill] sm:$0xff] }
 0x1ae   : > { %v1370_v61 = vsel %vm1335_vm12, %v4827_v27, %v4826_v52  ;;  %v1939_v3 = vsel %vm1335_vm12, %v1936_v55, %v4829_v40  ;;  %v1404_v19 = vadd.f32 %v1368_v13, %v1278_v51  ;;  %v4834_v30 = vrot.slane %v4833_v43, 1  ;;  %2596 = vmatprep.mubr.msk.bf16.mxu1 %vm2092_vm7, %v2064_v47 }
 0x1af   : > { %v1405_v35 = vadd.f32 %v1370_v61, %v4830_v54  ;;  %v1977_v0 = vadd.f32 %v1939_v3, %v1852_v12  ;;  %v4836_v8 = vrot.slane %v4835_v45, 1  ;;  %v4837_v34 = vmov %v4832_v2  ;;  %v4858_v61 = vld [vmem:[#allocation83_spill] sm:$0xff] }
 0x1b0   : > { %v1530_v1 = vsel %vm1209_vm8, %v4834_v30, %v4832_v2  ;;  %v1653_v33 = vrot.slane %v4838_v46, 2  ;;  %v1654_v16 = vrot.slane %v4839_v25, 2  ;;  %v1999_v18 = vmul.f32 %v3795_v36, %v1976_v29  ;;  %v4859_v54 = vld [vmem:[#allocation75_spill] sm:$0xff] }
 0x1b1   : > { %v1532_v31 = vsel %vm1209_vm8, %v4837_v34, %v4836_v8  ;;  %v1441_v21 = vadd.f32 %v4840_v24, %v1404_v19  ;;  %v1442_v5 = vadd.f32 %v4841_v28, %v1405_v35  ;;  %v4843_v38 = vrot.slane %v4842_v42, 1 }
 0x1b2   : > { %v4845_v56 = vrot.slane %v4844_v48, 1  ;;  %v2000_v32 = vmul.f32 %v3795_v36, %v1977_v0  ;;  %v1655_v62 = vsel %vm1335_vm12, %v1653_v33, %v1654_v16  ;;  %v4847_v26 = vrot.slane %v4846_v39, 2  ;;  %v2262_v48 = vld [vmem:[%s4366_s29 + $0x10] sm:$0xff] }
 0x1b3   : > { %v4849_v57 = vrot.slane %v4848_v17, 1  ;;  %v4850_v41 = vmov %v4843_v38  ;;  %v2022_v49 = vadd.f32 %v3814_v50, %v1999_v18  ;;  %v1566_v11 = vadd.f32 %v1530_v1, %v1441_v21  ;;  %v2263_v17 = vld [vmem:[%s4366_s29 + $0x18] sm:$0xff] }
 0x1b4   : > { %v1817_v60 = vsel %vm1209_vm8, %v4845_v56, %v4843_v38  ;;  %v1657_v22 = vsel %vm1335_vm12, %v1654_v16, %v4847_v26  ;;  %v1567_v20 = vadd.f32 %v1532_v31, %v1442_v5  ;;  %v4852_v55 = vrot.slane %v4851_v7, 2  ;;  %v4371_v5 = vld [vmem:[%s4482_s9] ss:$0 sm:$0xff] }
 0x1b5   : > { %v1819_v44 = vsel %vm1209_vm8, %v4850_v41, %v4849_v57  ;;  %v4854_v23 = vrot.slane %v4853_v59, 2  ;;  %v2023_v6 = vadd.f32 %v3814_v50, %v2000_v32  ;;  %v4856_v10 = vrot.slane %v4855_v4, 2 }
 0x1b6   : > { %v4857_v13 = vmov %v4852_v55  ;;  %v2003_v52 = vmul.f32 %v3795_v36, %v4056_v58  ;;  %v2004_v27 = vmul.f32 %v3795_v36, %v4058_v53  ;;  %v1713_v47 = vmul.f32 %v4248_v9, %v4858_v61 }
 0x1b7   : > { %v1942_v51 = vsel %vm1335_vm12, %v4854_v23, %v4852_v55  ;;  %v1944_v15 = vsel %vm1335_vm12, %v4857_v13, %v4856_v10  ;;  %v2038_v12 = vmax.f32 %v2022_v49, 0.0  ;;  %v1691_v63 = vadd.f32 %v1655_v62, %v1566_v11  ;;  %v2260_v62 = vld [vmem:[%s4366_s29] sm:$0xff]  ;;  %v2261_v49 = vld [vmem:[%s4366_s29 + $0x8] sm:$0xff] }
 0x1b8   : > { %v1692_v14 = vadd.f32 %v1657_v22, %v1567_v20  ;;  %v2039_v40 = vmax.f32 %v2023_v6, 0.0  ;;  %v2026_v3 = vadd.f32 %v3814_v50, %v2003_v52  ;;  %v2027_v29 = vadd.f32 %v3814_v50, %v2004_v27  ;;  %v2266_v6 = vld [vmem:[%s4366_s29 + $0x30] sm:$0xff] }
 0x1b9   : > { %v2054_v19 = vmin.f32 %v2038_v12, 6.0  ;;  %v1728_v35 = vadd.f32 %v4859_v54, %v1691_v63 }
 0x1ba   : > { %v1729_v37 = vadd.f32 %v1713_v47, %v1692_v14  ;;  %v2055_v2 = vmin.f32 %v2039_v40, 6.0  ;;  %v2042_v58 = vmax.f32 %v2026_v3, 0.0  ;;  %v2043_v43 = vmax.f32 %v2027_v29, 0.0  ;;  %v2267_v47 = vld [vmem:[%s4366_s29 + $0x38] sm:$0xff]  ;;  %v2265_v40 = vld [vmem:[%s4366_s29 + $0x28] sm:$0xff] }
 0x1bb   : > { %v1853_v30 = vadd.f32 %v1817_v60, %v1728_v35 }
 0x1bc   : > { %v1854_v53 = vadd.f32 %v1819_v44, %v1729_v37  ;;  %v2065_v1 = vpack.c.bf16 %v2055_v2, %v2054_v19  ;;  %v2058_v0 = vmin.f32 %v2042_v58, 6.0  ;;  %v2059_v9 = vmin.f32 %v2043_v43, 6.0  ;;  %v2270_v58 = vld [vmem:[%s4366_s29 + $0x50] sm:$0xff] }
 0x1bd   : > { %v1978_v45 = vadd.f32 %v1942_v51, %v1853_v30 }
 0x1be   : > { %v1979_v8 = vadd.f32 %v1944_v15, %v1854_v53  ;;  %2597 = vmatmul.mubr.msk.bf16.gmra.mrb[20].mxu1 %vm2092_vm7, %v2065_v1  ;;  %v2067_v34 = vpack.c.bf16 %v2059_v9, %v2058_v0  ;;  %v2264_v15 = vld [vmem:[%s4366_s29 + $0x20] sm:$0xff] }
 0x1bf   : > { %v2001_v31 = vmul.f32 %v3795_v36, %v1978_v45  ;;  %v2268_v1 = vld [vmem:[%s4366_s29 + $0x40] sm:$0xff] }
 0x1c0   : > { %v2002_v46 = vmul.f32 %v3795_v36, %v1979_v8  ;;  %v4361_v36 = vld [vmem:[%s4481_s8] ss:$0 sm:$0xff]  ;;  %v2271_v8 = vld [vmem:[%s4366_s29 + $0x58] sm:$0xff] }
 0x1c1   : > { %v2024_v33 = vadd.f32 %v3814_v50, %v2001_v31 }
 0x1c2   : > { %v2025_v25 = vadd.f32 %v3814_v50, %v2002_v46 }
 0x1c3   : > { %v2040_v16 = vmax.f32 %v2024_v33, 0.0  ;;  %v2269_v33 = vld [vmem:[%s4366_s29 + $0x48] sm:$0xff] }
 0x1c4   : > { %v2041_v18 = vmax.f32 %v2025_v25, 0.0 }
 0x1c5   : > { %v2056_v24 = vmin.f32 %v2040_v16, 6.0 }
 0x1c6   : > { %v2057_v21 = vmin.f32 %v2041_v18, 6.0 }
 0x1c8   : > { %v2066_v28 = vpack.c.bf16 %v2057_v21, %v2056_v24 }
 0x1ca   : > { %2600 = vmatprep.mubr.msk.bf16.mxu1 %vm2092_vm7, %v2066_v28 }
 0x1cb   : > { %2601 = vmatmul.mubr.msk.bf16.gmra.mrb[24].mxu1 %vm2092_vm7, %v2067_v34 }
 0x24e   : > { %v2590_v50 = vpop.f32.mrb[12].mxu1 }
 0x24f   : > { %v2223_v42 = vmul.f32 %v2590_v50, %v4361_v36  ;;  %v2151_v38 = vpop.f32.mrb[13].mxu1 }
 0x250   : > { %v2221_v56 = vmul.f32 %v4361_v36, %v2151_v38  ;;  %v2591_v60 = vpop.f32.mrb[14].mxu1 }
 0x251   : > { %v2246_v32 = vadd.f32 %v4371_v5, %v2223_v42  ;;  %v2224_v39 = vmul.f32 %v2591_v60, %v4361_v36  ;;  %v2154_v26 = vpop.f32.mrb[15].mxu1  ;;  %v2274_v42 = vld [vmem:[%s4366_s29 + $0x70] sm:$0xff]  ;;  %v2272_v60 = vld [vmem:[%s4366_s29 + $0x60] sm:$0xff] }
 0x252   : > { %v2244_v22 = vadd.f32 %v4371_v5, %v2221_v56  ;;  %v2222_v57 = vmul.f32 %v4361_v36, %v2154_v26  ;;  %v2275_v26 = vld [vmem:[%s4366_s29 + $0x78] sm:$0xff] }
 0x253   : > { %v2278_v41 = vadd.f32 %v2262_v48, %v2246_v32  ;;  %v2247_v44 = vadd.f32 %v4371_v5, %v2224_v39 }
 0x254   : > { %v2276_v11 = vadd.f32 %v2260_v62, %v2244_v22  ;;  %v2245_v20 = vadd.f32 %v4371_v5, %v2222_v57 }
 0x255   : > { %2294 = vst.msk [vmem:[%s4382_s12 + $0x10] sm:$0xff] %vm597_vm1, %v2278_v41  ;;  %v2279_v7 = vadd.f32 %v2263_v17, %v2247_v44  ;;  %v2273_v41 = vld [vmem:[%s4366_s29 + $0x68] sm:$0xff] }
 0x256   : > { %2292 = vst.msk [vmem:[%s4382_s12] sm:$0xff] %vm597_vm1, %v2276_v11  ;;  %v2277_v55 = vadd.f32 %v2261_v49, %v2245_v20 }
 0x257   : > { %2295 = vst.msk [vmem:[%s4382_s12 + $0x18] sm:$0xff] %vm597_vm1, %v2279_v7 }
 0x258   : > { %2293 = vst.msk [vmem:[%s4382_s12 + $0x8] sm:$0xff] %vm597_vm1, %v2277_v55 }
 0x271   : > { %v2594_v59 = vpop.f32.mrb[16].mxu1 }
 0x272   : > { %v2227_v23 = vmul.f32 %v2594_v59, %v4361_v36  ;;  %v2167_v51 = vpop.f32.mrb[17].mxu1 }
 0x273   : > { %v2225_v4 = vmul.f32 %v4361_v36, %v2167_v51  ;;  %v2595_v10 = vpop.f32.mrb[18].mxu1 }
 0x274   : > { %v2250_v13 = vadd.f32 %v4371_v5, %v2227_v23  ;;  %v2228_v52 = vmul.f32 %v2595_v10, %v4361_v36  ;;  %v2170_v27 = vpop.f32.mrb[19].mxu1 }
 0x275   : > { %v2248_v61 = vadd.f32 %v4371_v5, %v2225_v4  ;;  %v2226_v12 = vmul.f32 %v4361_v36, %v2170_v27 }
 0x276   : > { %v2282_v63 = vadd.f32 %v2266_v6, %v2250_v13  ;;  %v2251_v14 = vadd.f32 %v4371_v5, %v2228_v52 }
 0x277   : > { %v2280_v3 = vadd.f32 %v2264_v15, %v2248_v61  ;;  %v2249_v29 = vadd.f32 %v4371_v5, %v2226_v12 }
 0x278   : > { %2298 = vst.msk [vmem:[%s4382_s12 + $0x30] sm:$0xff] %vm597_vm1, %v2282_v63  ;;  %v2283_v19 = vadd.f32 %v2267_v47, %v2251_v14 }
 0x279   : > { %2296 = vst.msk [vmem:[%s4382_s12 + $0x20] sm:$0xff] %vm597_vm1, %v2280_v3  ;;  %v2281_v54 = vadd.f32 %v2265_v40, %v2249_v29 }
 0x27a   : > { %2299 = vst.msk [vmem:[%s4382_s12 + $0x38] sm:$0xff] %vm597_vm1, %v2283_v19 }
 0x27b   : > { %2297 = vst.msk [vmem:[%s4382_s12 + $0x28] sm:$0xff] %vm597_vm1, %v2281_v54 }
 0x291   : > { %v2598_v35 = vpop.f32.mrb[20].mxu1 }
 0x292   : > { %v2231_v37 = vmul.f32 %v2598_v35, %v4361_v36  ;;  %v2183_v2 = vpop.f32.mrb[21].mxu1 }
 0x293   : > { %v2229_v43 = vmul.f32 %v4361_v36, %v2183_v2  ;;  %v2599_v30 = vpop.f32.mrb[22].mxu1 }
 0x294   : > { %v2254_v53 = vadd.f32 %v4371_v5, %v2231_v37  ;;  %v2232_v0 = vmul.f32 %v2599_v30, %v4361_v36  ;;  %v2186_v9 = vpop.f32.mrb[23].mxu1 }
 0x295   : > { %v2252_v45 = vadd.f32 %v4371_v5, %v2229_v43  ;;  %v2230_v34 = vmul.f32 %v4361_v36, %v2186_v9 }
 0x296   : > { %v2286_v31 = vadd.f32 %v2270_v58, %v2254_v53  ;;  %v2255_v46 = vadd.f32 %v4371_v5, %v2232_v0 }
 0x297   : > { %v2284_v25 = vadd.f32 %v2268_v1, %v2252_v45  ;;  %v2253_v16 = vadd.f32 %v4371_v5, %v2230_v34 }
 0x298   : > { %2302 = vst.msk [vmem:[%s4382_s12 + $0x50] sm:$0xff] %vm597_vm1, %v2286_v31  ;;  %v2287_v18 = vadd.f32 %v2271_v8, %v2255_v46 }
 0x299   : > { %2300 = vst.msk [vmem:[%s4382_s12 + $0x40] sm:$0xff] %vm597_vm1, %v2284_v25  ;;  %v2285_v24 = vadd.f32 %v2269_v33, %v2253_v16 }
 0x29a   : > { %2303 = vst.msk [vmem:[%s4382_s12 + $0x58] sm:$0xff] %vm597_vm1, %v2287_v18 }
 0x29b   : > { %2301 = vst.msk [vmem:[%s4382_s12 + $0x48] sm:$0xff] %vm597_vm1, %v2285_v24 }
 0x29e   : > { %v2602_v21 = vpop.f32.mrb[24].mxu1 }
 0x29f   : > { %v2235_v28 = vmul.f32 %v2602_v21, %v4361_v36  ;;  %v2199_v50 = vpop.f32.mrb[25].mxu1 }
 0x2a0   : > { %v2233_v38 = vmul.f32 %v4361_v36, %v2199_v50  ;;  %v2603_v48 = vpop.f32.mrb[26].mxu1 }
 0x2a1   : > { %v2258_v56 = vadd.f32 %v4371_v5, %v2235_v28  ;;  %v2236_v32 = vmul.f32 %v2603_v48, %v4361_v36  ;;  %v2202_v62 = vpop.f32.mrb[27].mxu1 }
 0x2a2   : > { %v2256_v39 = vadd.f32 %v4371_v5, %v2233_v38  ;;  %v2234_v22 = vmul.f32 %v4361_v36, %v2202_v62 }
 0x2a3   : > { %v2290_v17 = vadd.f32 %v2274_v42, %v2258_v56  ;;  %v2259_v57 = vadd.f32 %v4371_v5, %v2236_v32 }
 0x2a4   : > { %v2288_v44 = vadd.f32 %v2272_v60, %v2256_v39  ;;  %v2257_v49 = vadd.f32 %v4371_v5, %v2234_v22 }
 0x2a5   : > { %2306 = vst.msk [vmem:[%s4382_s12 + $0x70] sm:$0xff] %vm597_vm1, %v2290_v17  ;;  %v2291_v11 = vadd.f32 %v2275_v26, %v2259_v57 }
 0x2a6   : > { %2304 = vst.msk [vmem:[%s4382_s12 + $0x60] sm:$0xff] %vm597_vm1, %v2288_v44  ;;  %v2289_v20 = vadd.f32 %v2273_v41, %v2257_v49 }
 0x2a7   : > { %2307 = vst.msk [vmem:[%s4382_s12 + $0x78] sm:$0xff] %vm597_vm1, %v2291_v11 }
 0x2a8   : > { %2305 = vst.msk [vmem:[%s4382_s12 + $0x68] sm:$0xff] %vm597_vm1, %v2289_v20 }
 0x2a9 PF: > { %s21_s21 = sadd.s32 1, %s2718_s21   ;;  %s4860_s17 = smov %s2710_s19 }
 0x2aa   : > { %p18_p7 = scmp.ge.s32.totalorder %s21_s21, 6   ;;  %s4861_s18 = smov %s2714_s20 }
 0x2ab   : > { %s4862_s19 = smov %s4865_s22  ;;  %s4863_s20 = smov %s4869_s23 }
 0x2ac   :  { %20 = sbr.rel (!%p18_p7) target bundleno = 3 (0x3), region = 98 }

</bundles_post_ra>
